<compile_context>
chip_gen: v5e
topology: v5e:2x2
jax: 0.10.0
libtpu: 0.0.40
codegen_flags: <defaults>
</compile_context>

<pallas_src>
import math

import numpy as np
import jax
import jax.numpy as jnp
from jax.experimental import pallas as pl
from jax.experimental.pallas import tpu as pltpu

# ---- static model dimensions -------------------------------------------------
B = 2                       # batch
H0 = W0 = 28                # input spatial (MNIST-like)
K = 5                       # conv kernel size
C1_IN, C1_OUT = 1, 2
C2_IN, C2_OUT = 2, 2
H1 = W1 = H0 - K + 1        # 24
H2 = W2 = H1 - K + 1        # 20
FLAT = C2_OUT * H2 * W2     # 800
HID = 16
OUT = 10
ROW2 = C2_OUT * W2          # 40 : one conv2 output row across both channels


# ---- fused kernel ------------------------------------------------------------
def fused_net_kernel(x1_ref, t1_ref, b1_ref, t2_ref, b2_ref,
                     w3_ref, b3_ref, w4_ref, b4_ref, o_ref, flat_ref):
    """Whole forward pass in one kernel.

    x1_ref : (B*H1, K*W0)   = (48, 140)   row-shifted input, x1[b*24+i, di*28+p] = x[b, i+di, p]
    t1_ref : (K*W0, C1_OUT*W1) = (140, 48) Toeplitz-expanded conv1 weights
    b1_ref : (1, C1_OUT*W1) = (1, 48)
    t2_ref : (K, C2_IN*W1, C2_OUT*W2) = (5, 48, 40) Toeplitz-expanded conv2 weights (per row shift)
    b2_ref : (1, C2_OUT*W2) = (1, 40)
    w3_ref : (FLAT, HID)    = (800, 16)   FC1 weights, rows permuted to (i, c, j) order
    b3_ref : (1, HID)
    w4_ref : (HID, OUT)     = (16, 10)
    b4_ref : (1, OUT)
    o_ref  : (B, OUT)
    flat_ref: VMEM scratch (B, FLAT) holding the flattened conv2 activations.
    """
    # ---- conv1 + ReLU : one MXU matmul against the Toeplitz weights ----
    y1 = jnp.dot(x1_ref[...], t1_ref[...], preferred_element_type=jnp.float32)
    y1 = jnp.maximum(y1 + b1_ref[...], 0.0)        # (48, 48); row = b*24+i, col = c*24 + p

    t2 = t2_ref[...]                               # (K, 48, 40)
    b2 = b2_ref[...]                               # (1, 40)
    for b in range(B):
        # ---- conv2 + ReLU : accumulate K row-shifted MXU matmuls (no lane shifts) ----
        acc = jnp.dot(y1[b * H1: b * H1 + H2, :], t2[0],
                      preferred_element_type=jnp.float32)
        for di in range(1, K):
            acc = acc + jnp.dot(y1[b * H1 + di: b * H1 + di + H2, :], t2[di],
                                preferred_element_type=jnp.float32)
        y2 = jnp.maximum(acc + b2, 0.0)            # (20, 40); col = c*20 + j

        # ---- "flatten" without in-kernel reshape: lane-sliced stores into the
        #      (B, 800) scratch in (i, c, j) order (w3 rows are pre-permuted to match).
        for i in range(H2):
            flat_ref[b:b + 1, i * ROW2:(i + 1) * ROW2] = y2[i:i + 1, :]

    # ---- FC1 + ReLU + FC2 : two MXU matmuls ----
    flat = flat_ref[...]                           # (B, 800)
    h = jnp.dot(flat, w3_ref[...], preferred_element_type=jnp.float32) + b3_ref[...]
    h = jnp.maximum(h, 0.0)
    o_ref[...] = jnp.dot(h, w4_ref[...], preferred_element_type=jnp.float32) + b4_ref[...]


# ---- wrapper glue (pure layout / parameter preprocessing, XLA side) ----------
def _toeplitz_weights(w, in_w, out_w):
    """Lower a KxK 'valid' conv to a matmul weight.

    Returns T of shape (K*C_in*in_w, C_out*out_w) with
      T[di*(C_in*in_w) + ci*in_w + p, co*out_w + j] = w[co, ci, di, p - j]   (0 <= p-j < K, else 0)
    so that   sum_{di,p,ci} X[.., di, ci, p] * T[...]  ==  valid cross-correlation (torch Conv2d).
    """
    c_out, c_in, k, _ = w.shape
    sel = np.zeros((k, in_w, out_w), np.float32)           # sel[dj, p, j] = (p == j + dj)
    for dj in range(k):
        for j in range(out_w):
            sel[dj, j + dj, j] = 1.0
    t = jnp.einsum('ocid,dpj->icpoj', w, jnp.asarray(sel))  # (di, ci, p, co, j)
    return t.reshape(k * c_in * in_w, c_out * out_w)


@jax.jit
def net_forward(x, params):
    w1, b1, w2, b2, w3, b3, w4, b4 = params
    x3 = x.reshape(B, H0, W0)                                # squeeze the single input channel

    # Lane-dense, row-shifted presentation of the input (im2col-style glue):
    #   x1[b*H1 + i, di*W0 + p] = x[b, i+di, p]
    x1 = jnp.stack([x3[:, di:di + H1, :] for di in range(K)], axis=2)   # (B, H1, K, W0)
    x1 = x1.reshape(B * H1, K * W0)                                     # (48, 140)

    t1 = _toeplitz_weights(w1, W0, W1)                                  # (140, 48)
    t2 = _toeplitz_weights(w2, W1, W2).reshape(K, C2_IN * W1, C2_OUT * W2)  # (5, 48, 40)
    b1r = jnp.repeat(b1, W1)[None, :]                                   # (1, 48)
    b2r = jnp.repeat(b2, W2)[None, :]                                   # (1, 40)

    # torch Linear: y = x @ W.T + b.  Permute W3's rows from torch's (c, i, j)
    # flatten order to the kernel's (i, c, j) order; pre-transpose W4.
    w3p = w3.reshape(HID, C2_OUT, H2, W2).transpose(2, 1, 3, 0).reshape(FLAT, HID)
    w4p = w4.T

    vmem = pl.BlockSpec(memory_space=pltpu.MemorySpace.VMEM)
    return pl.pallas_call(
        fused_net_kernel,
        out_shape=jax.ShapeDtypeStruct((B, OUT), jnp.float32),
        in_specs=[vmem] * 9,
        out_specs=vmem,
        scratch_shapes=[pltpu.VMEM((B, FLAT), jnp.float32)],
    )(x1, t1, b1r, t2, b2r, w3p, b3[None, :], w4p, b4[None, :])


def init_params(key):
    """Deterministic init mimicking torch's default uniform(-1/sqrt(fan_in), ...)."""
    ks = jax.random.split(key, 8)

    def u(k, shape, fan_in):
        bound = 1.0 / math.sqrt(fan_in)
        return jax.random.uniform(k, shape, jnp.float32, -bound, bound)

    w1 = u(ks[0], (C1_OUT, C1_IN, K, K), C1_IN * K * K)
    b1 = u(ks[1], (C1_OUT,), C1_IN * K * K)
    w2 = u(ks[2], (C2_OUT, C2_IN, K, K), C2_IN * K * K)
    b2 = u(ks[3], (C2_OUT,), C2_IN * K * K)
    w3 = u(ks[4], (HID, FLAT), FLAT)
    b3 = u(ks[5], (HID,), FLAT)
    w4 = u(ks[6], (OUT, HID), HID)
    b4 = u(ks[7], (OUT,), HID)
    return (w1, b1, w2, b2, w3, b3, w4, b4)


if __name__ == "__main__":
    key = jax.random.PRNGKey(0)
    k_x, k_p = jax.random.split(key)
    x = jax.random.normal(k_x, (B, C1_IN, H0, W0), jnp.float32)
    params = init_params(k_p)

    out = net_forward(x, params)
    out = jax.block_until_ready(out)
    assert out.shape == (B, OUT) and out.dtype == jnp.float32
    assert bool(jnp.all(jnp.isfinite(out)))
    print("KERNEL_OK")
</pallas_src>

<mosaic_0001>
module attributes {stable_mosaic.version = 11 : i64} {
  func.func @fused_net_kernel(%arg0: memref<48x140xf32, #tpu.memory_space<vmem>>, %arg1: memref<140x48xf32, #tpu.memory_space<vmem>>, %arg2: memref<1x48xf32, #tpu.memory_space<vmem>>, %arg3: memref<5x48x40xf32, #tpu.memory_space<vmem>>, %arg4: memref<1x40xf32, #tpu.memory_space<vmem>>, %arg5: memref<800x16xf32, #tpu.memory_space<vmem>>, %arg6: memref<1x16xf32, #tpu.memory_space<vmem>>, %arg7: memref<16x10xf32, #tpu.memory_space<vmem>>, %arg8: memref<1x10xf32, #tpu.memory_space<vmem>>, %arg9: memref<2x10xf32, #tpu.memory_space<vmem>>, %arg10: memref<2x800xf32, #tpu.memory_space<vmem>>) attributes {dimension_semantics = [], scalar_prefetch = 0 : i64, scratch_operands = 1 : i64, tpu.core_type = #tpu.core_type<tc>} {
    %c0 = arith.constant 0 : index
    %c0_0 = arith.constant 0 : index
    %0 = vector.load %arg0[%c0, %c0_0] : memref<48x140xf32, #tpu.memory_space<vmem>>, vector<48x140xf32>
    %c0_1 = arith.constant 0 : index
    %c0_2 = arith.constant 0 : index
    %1 = vector.load %arg1[%c0_1, %c0_2] : memref<140x48xf32, #tpu.memory_space<vmem>>, vector<140x48xf32>
    %cst = arith.constant dense<0.000000e+00> : vector<48x48xf32>
    %2 = tpu.matmul %0, %1, %cst {dimension_numbers = #tpu.dot_dimension_numbers<[1], [0], [0], [1], [0, 0, 1, 1], [], []>} : vector<48x140xf32>, vector<140x48xf32>, vector<48x48xf32> -> vector<48x48xf32>
    %c0_3 = arith.constant 0 : index
    %c0_4 = arith.constant 0 : index
    %3 = vector.load %arg2[%c0_3, %c0_4] : memref<1x48xf32, #tpu.memory_space<vmem>>, vector<1x48xf32>
    %4 = vector.broadcast %3 : vector<1x48xf32> to vector<48x48xf32>
    %5 = arith.addf %2, %4 : vector<48x48xf32>
    %cst_5 = arith.constant 0.000000e+00 : f32
    %6 = vector.broadcast %cst_5 : f32 to vector<48x48xf32>
    %7 = arith.maximumf %5, %6 : vector<48x48xf32>
    %c0_6 = arith.constant 0 : index
    %c0_7 = arith.constant 0 : index
    %c0_8 = arith.constant 0 : index
    %8 = vector.load %arg3[%c0_6, %c0_7, %c0_8] : memref<5x48x40xf32, #tpu.memory_space<vmem>>, vector<5x48x40xf32>
    %c0_9 = arith.constant 0 : index
    %c0_10 = arith.constant 0 : index
    %9 = vector.load %arg4[%c0_9, %c0_10] : memref<1x40xf32, #tpu.memory_space<vmem>>, vector<1x40xf32>
    %10 = vector.extract_strided_slice %7 {offsets = [0, 0], sizes = [20, 48], strides = [1, 1]} : vector<48x48xf32> to vector<20x48xf32>
    %11 = vector.extract_strided_slice %8 {offsets = [0, 0, 0], sizes = [1, 48, 40], strides = [1, 1, 1]} : vector<5x48x40xf32> to vector<1x48x40xf32>
    %12 = vector.shape_cast %11 : vector<1x48x40xf32> to vector<48x40xf32>
    %cst_11 = arith.constant dense<0.000000e+00> : vector<20x40xf32>
    %13 = tpu.matmul %10, %12, %cst_11 {dimension_numbers = #tpu.dot_dimension_numbers<[1], [0], [0], [1], [0, 0, 1, 1], [], []>} : vector<20x48xf32>, vector<48x40xf32>, vector<20x40xf32> -> vector<20x40xf32>
    %14 = vector.extract_strided_slice %7 {offsets = [1, 0], sizes = [20, 48], strides = [1, 1]} : vector<48x48xf32> to vector<20x48xf32>
    %15 = vector.extract_strided_slice %8 {offsets = [1, 0, 0], sizes = [1, 48, 40], strides = [1, 1, 1]} : vector<5x48x40xf32> to vector<1x48x40xf32>
    %16 = vector.shape_cast %15 : vector<1x48x40xf32> to vector<48x40xf32>
    %cst_12 = arith.constant dense<0.000000e+00> : vector<20x40xf32>
    %17 = tpu.matmul %14, %16, %cst_12 {dimension_numbers = #tpu.dot_dimension_numbers<[1], [0], [0], [1], [0, 0, 1, 1], [], []>} : vector<20x48xf32>, vector<48x40xf32>, vector<20x40xf32> -> vector<20x40xf32>
    %18 = arith.addf %13, %17 : vector<20x40xf32>
    %19 = vector.extract_strided_slice %7 {offsets = [2, 0], sizes = [20, 48], strides = [1, 1]} : vector<48x48xf32> to vector<20x48xf32>
    %20 = vector.extract_strided_slice %8 {offsets = [2, 0, 0], sizes = [1, 48, 40], strides = [1, 1, 1]} : vector<5x48x40xf32> to vector<1x48x40xf32>
    %21 = vector.shape_cast %20 : vector<1x48x40xf32> to vector<48x40xf32>
    %cst_13 = arith.constant dense<0.000000e+00> : vector<20x40xf32>
    %22 = tpu.matmul %19, %21, %cst_13 {dimension_numbers = #tpu.dot_dimension_numbers<[1], [0], [0], [1], [0, 0, 1, 1], [], []>} : vector<20x48xf32>, vector<48x40xf32>, vector<20x40xf32> -> vector<20x40xf32>
    %23 = arith.addf %18, %22 : vector<20x40xf32>
    %24 = vector.extract_strided_slice %7 {offsets = [3, 0], sizes = [20, 48], strides = [1, 1]} : vector<48x48xf32> to vector<20x48xf32>
    %25 = vector.extract_strided_slice %8 {offsets = [3, 0, 0], sizes = [1, 48, 40], strides = [1, 1, 1]} : vector<5x48x40xf32> to vector<1x48x40xf32>
    %26 = vector.shape_cast %25 : vector<1x48x40xf32> to vector<48x40xf32>
    %cst_14 = arith.constant dense<0.000000e+00> : vector<20x40xf32>
    %27 = tpu.matmul %24, %26, %cst_14 {dimension_numbers = #tpu.dot_dimension_numbers<[1], [0], [0], [1], [0, 0, 1, 1], [], []>} : vector<20x48xf32>, vector<48x40xf32>, vector<20x40xf32> -> vector<20x40xf32>
    %28 = arith.addf %23, %27 : vector<20x40xf32>
    %29 = vector.extract_strided_slice %7 {offsets = [4, 0], sizes = [20, 48], strides = [1, 1]} : vector<48x48xf32> to vector<20x48xf32>
    %30 = vector.extract_strided_slice %8 {offsets = [4, 0, 0], sizes = [1, 48, 40], strides = [1, 1, 1]} : vector<5x48x40xf32> to vector<1x48x40xf32>
    %31 = vector.shape_cast %30 : vector<1x48x40xf32> to vector<48x40xf32>
    %cst_15 = arith.constant dense<0.000000e+00> : vector<20x40xf32>
    %32 = tpu.matmul %29, %31, %cst_15 {dimension_numbers = #tpu.dot_dimension_numbers<[1], [0], [0], [1], [0, 0, 1, 1], [], []>} : vector<20x48xf32>, vector<48x40xf32>, vector<20x40xf32> -> vector<20x40xf32>
    %33 = arith.addf %28, %32 : vector<20x40xf32>
    %34 = vector.broadcast %9 : vector<1x40xf32> to vector<20x40xf32>
    %35 = arith.addf %33, %34 : vector<20x40xf32>
    %cst_16 = arith.constant 0.000000e+00 : f32
    %36 = vector.broadcast %cst_16 : f32 to vector<20x40xf32>
    %37 = arith.maximumf %35, %36 : vector<20x40xf32>
    %38 = vector.extract_strided_slice %37 {offsets = [0, 0], sizes = [1, 40], strides = [1, 1]} : vector<20x40xf32> to vector<1x40xf32>
    %c0_17 = arith.constant 0 : index
    %c0_18 = arith.constant 0 : index
    %39 = vector.load %arg10[%c0_17, %c0_18] : memref<2x800xf32, #tpu.memory_space<vmem>>, vector<1x40xf32>
    tpu.vector_store %arg10[%c0_17, %c0_18], %38 {strides = array<i32>} : memref<2x800xf32, #tpu.memory_space<vmem>>, vector<1x40xf32>,
    %40 = vector.extract_strided_slice %37 {offsets = [1, 0], sizes = [1, 40], strides = [1, 1]} : vector<20x40xf32> to vector<1x40xf32>
    %c0_19 = arith.constant 0 : index
    %c40 = arith.constant 40 : index
    %41 = vector.load %arg10[%c0_19, %c40] : memref<2x800xf32, #tpu.memory_space<vmem>>, vector<1x40xf32>
    tpu.vector_store %arg10[%c0_19, %c40], %40 {strides = array<i32>} : memref<2x800xf32, #tpu.memory_space<vmem>>, vector<1x40xf32>,
    %42 = vector.extract_strided_slice %37 {offsets = [2, 0], sizes = [1, 40], strides = [1, 1]} : vector<20x40xf32> to vector<1x40xf32>
    %c0_20 = arith.constant 0 : index
    %c80 = arith.constant 80 : index
    %43 = vector.load %arg10[%c0_20, %c80] : memref<2x800xf32, #tpu.memory_space<vmem>>, vector<1x40xf32>
    tpu.vector_store %arg10[%c0_20, %c80], %42 {strides = array<i32>} : memref<2x800xf32, #tpu.memory_space<vmem>>, vector<1x40xf32>,
    %44 = vector.extract_strided_slice %37 {offsets = [3, 0], sizes = [1, 40], strides = [1, 1]} : vector<20x40xf32> to vector<1x40xf32>
    %c0_21 = arith.constant 0 : index
    %c120 = arith.constant 120 : index
    %45 = vector.load %arg10[%c0_21, %c120] : memref<2x800xf32, #tpu.memory_space<vmem>>, vector<1x40xf32>
    tpu.vector_store %arg10[%c0_21, %c120], %44 {strides = array<i32>} : memref<2x800xf32, #tpu.memory_space<vmem>>, vector<1x40xf32>,
    %46 = vector.extract_strided_slice %37 {offsets = [4, 0], sizes = [1, 40], strides = [1, 1]} : vector<20x40xf32> to vector<1x40xf32>
    %c0_22 = arith.constant 0 : index
    %c160 = arith.constant 160 : index
    %47 = vector.load %arg10[%c0_22, %c160] : memref<2x800xf32, #tpu.memory_space<vmem>>, vector<1x40xf32>
    tpu.vector_store %arg10[%c0_22, %c160], %46 {strides = array<i32>} : memref<2x800xf32, #tpu.memory_space<vmem>>, vector<1x40xf32>,
    %48 = vector.extract_strided_slice %37 {offsets = [5, 0], sizes = [1, 40], strides = [1, 1]} : vector<20x40xf32> to vector<1x40xf32>
    %c0_23 = arith.constant 0 : index
    %c200 = arith.constant 200 : index
    %49 = vector.load %arg10[%c0_23, %c200] : memref<2x800xf32, #tpu.memory_space<vmem>>, vector<1x40xf32>
    tpu.vector_store %arg10[%c0_23, %c200], %48 {strides = array<i32>} : memref<2x800xf32, #tpu.memory_space<vmem>>, vector<1x40xf32>,
    %50 = vector.extract_strided_slice %37 {offsets = [6, 0], sizes = [1, 40], strides = [1, 1]} : vector<20x40xf32> to vector<1x40xf32>
    %c0_24 = arith.constant 0 : index
    %c240 = arith.constant 240 : index
    %51 = vector.load %arg10[%c0_24, %c240] : memref<2x800xf32, #tpu.memory_space<vmem>>, vector<1x40xf32>
    tpu.vector_store %arg10[%c0_24, %c240], %50 {strides = array<i32>} : memref<2x800xf32, #tpu.memory_space<vmem>>, vector<1x40xf32>,
    %52 = vector.extract_strided_slice %37 {offsets = [7, 0], sizes = [1, 40], strides = [1, 1]} : vector<20x40xf32> to vector<1x40xf32>
    %c0_25 = arith.constant 0 : index
    %c280 = arith.constant 280 : index
    %53 = vector.load %arg10[%c0_25, %c280] : memref<2x800xf32, #tpu.memory_space<vmem>>, vector<1x40xf32>
    tpu.vector_store %arg10[%c0_25, %c280], %52 {strides = array<i32>} : memref<2x800xf32, #tpu.memory_space<vmem>>, vector<1x40xf32>,
    %54 = vector.extract_strided_slice %37 {offsets = [8, 0], sizes = [1, 40], strides = [1, 1]} : vector<20x40xf32> to vector<1x40xf32>
    %c0_26 = arith.constant 0 : index
    %c320 = arith.constant 320 : index
    %55 = vector.load %arg10[%c0_26, %c320] : memref<2x800xf32, #tpu.memory_space<vmem>>, vector<1x40xf32>
    tpu.vector_store %arg10[%c0_26, %c320], %54 {strides = array<i32>} : memref<2x800xf32, #tpu.memory_space<vmem>>, vector<1x40xf32>,
    %56 = vector.extract_strided_slice %37 {offsets = [9, 0], sizes = [1, 40], strides = [1, 1]} : vector<20x40xf32> to vector<1x40xf32>
    %c0_27 = arith.constant 0 : index
    %c360 = arith.constant 360 : index
    %57 = vector.load %arg10[%c0_27, %c360] : memref<2x800xf32, #tpu.memory_space<vmem>>, vector<1x40xf32>
    tpu.vector_store %arg10[%c0_27, %c360], %56 {strides = array<i32>} : memref<2x800xf32, #tpu.memory_space<vmem>>, vector<1x40xf32>,
    %58 = vector.extract_strided_slice %37 {offsets = [10, 0], sizes = [1, 40], strides = [1, 1]} : vector<20x40xf32> to vector<1x40xf32>
    %c0_28 = arith.constant 0 : index
    %c400 = arith.constant 400 : index
    %59 = vector.load %arg10[%c0_28, %c400] : memref<2x800xf32, #tpu.memory_space<vmem>>, vector<1x40xf32>
    tpu.vector_store %arg10[%c0_28, %c400], %58 {strides = array<i32>} : memref<2x800xf32, #tpu.memory_space<vmem>>, vector<1x40xf32>,
    %60 = vector.extract_strided_slice %37 {offsets = [11, 0], sizes = [1, 40], strides = [1, 1]} : vector<20x40xf32> to vector<1x40xf32>
    %c0_29 = arith.constant 0 : index
    %c440 = arith.constant 440 : index
    %61 = vector.load %arg10[%c0_29, %c440] : memref<2x800xf32, #tpu.memory_space<vmem>>, vector<1x40xf32>
    tpu.vector_store %arg10[%c0_29, %c440], %60 {strides = array<i32>} : memref<2x800xf32, #tpu.memory_space<vmem>>, vector<1x40xf32>,
    %62 = vector.extract_strided_slice %37 {offsets = [12, 0], sizes = [1, 40], strides = [1, 1]} : vector<20x40xf32> to vector<1x40xf32>
    %c0_30 = arith.constant 0 : index
    %c480 = arith.constant 480 : index
    %63 = vector.load %arg10[%c0_30, %c480] : memref<2x800xf32, #tpu.memory_space<vmem>>, vector<1x40xf32>
    tpu.vector_store %arg10[%c0_30, %c480], %62 {strides = array<i32>} : memref<2x800xf32, #tpu.memory_space<vmem>>, vector<1x40xf32>,
    %64 = vector.extract_strided_slice %37 {offsets = [13, 0], sizes = [1, 40], strides = [1, 1]} : vector<20x40xf32> to vector<1x40xf32>
    %c0_31 = arith.constant 0 : index
    %c520 = arith.constant 520 : index
    %65 = vector.load %arg10[%c0_31, %c520] : memref<2x800xf32, #tpu.memory_space<vmem>>, vector<1x40xf32>
    tpu.vector_store %arg10[%c0_31, %c520], %64 {strides = array<i32>} : memref<2x800xf32, #tpu.memory_space<vmem>>, vector<1x40xf32>,
    %66 = vector.extract_strided_slice %37 {offsets = [14, 0], sizes = [1, 40], strides = [1, 1]} : vector<20x40xf32> to vector<1x40xf32>
    %c0_32 = arith.constant 0 : index
    %c560 = arith.constant 560 : index
    %67 = vector.load %arg10[%c0_32, %c560] : memref<2x800xf32, #tpu.memory_space<vmem>>, vector<1x40xf32>
    tpu.vector_store %arg10[%c0_32, %c560], %66 {strides = array<i32>} : memref<2x800xf32, #tpu.memory_space<vmem>>, vector<1x40xf32>,
    %68 = vector.extract_strided_slice %37 {offsets = [15, 0], sizes = [1, 40], strides = [1, 1]} : vector<20x40xf32> to vector<1x40xf32>
    %c0_33 = arith.constant 0 : index
    %c600 = arith.constant 600 : index
    %69 = vector.load %arg10[%c0_33, %c600] : memref<2x800xf32, #tpu.memory_space<vmem>>, vector<1x40xf32>
    tpu.vector_store %arg10[%c0_33, %c600], %68 {strides = array<i32>} : memref<2x800xf32, #tpu.memory_space<vmem>>, vector<1x40xf32>,
    %70 = vector.extract_strided_slice %37 {offsets = [16, 0], sizes = [1, 40], strides = [1, 1]} : vector<20x40xf32> to vector<1x40xf32>
    %c0_34 = arith.constant 0 : index
    %c640 = arith.constant 640 : index
    %71 = vector.load %arg10[%c0_34, %c640] : memref<2x800xf32, #tpu.memory_space<vmem>>, vector<1x40xf32>
    tpu.vector_store %arg10[%c0_34, %c640], %70 {strides = array<i32>} : memref<2x800xf32, #tpu.memory_space<vmem>>, vector<1x40xf32>,
    %72 = vector.extract_strided_slice %37 {offsets = [17, 0], sizes = [1, 40], strides = [1, 1]} : vector<20x40xf32> to vector<1x40xf32>
    %c0_35 = arith.constant 0 : index
    %c680 = arith.constant 680 : index
    %73 = vector.load %arg10[%c0_35, %c680] : memref<2x800xf32, #tpu.memory_space<vmem>>, vector<1x40xf32>
    tpu.vector_store %arg10[%c0_35, %c680], %72 {strides = array<i32>} : memref<2x800xf32, #tpu.memory_space<vmem>>, vector<1x40xf32>,
    %74 = vector.extract_strided_slice %37 {offsets = [18, 0], sizes = [1, 40], strides = [1, 1]} : vector<20x40xf32> to vector<1x40xf32>
    %c0_36 = arith.constant 0 : index
    %c720 = arith.constant 720 : index
    %75 = vector.load %arg10[%c0_36, %c720] : memref<2x800xf32, #tpu.memory_space<vmem>>, vector<1x40xf32>
    tpu.vector_store %arg10[%c0_36, %c720], %74 {strides = array<i32>} : memref<2x800xf32, #tpu.memory_space<vmem>>, vector<1x40xf32>,
    %76 = vector.extract_strided_slice %37 {offsets = [19, 0], sizes = [1, 40], strides = [1, 1]} : vector<20x40xf32> to vector<1x40xf32>
    %c0_37 = arith.constant 0 : index
    %c760 = arith.constant 760 : index
    %77 = vector.load %arg10[%c0_37, %c760] : memref<2x800xf32, #tpu.memory_space<vmem>>, vector<1x40xf32>
    tpu.vector_store %arg10[%c0_37, %c760], %76 {strides = array<i32>} : memref<2x800xf32, #tpu.memory_space<vmem>>, vector<1x40xf32>,
    %78 = vector.extract_strided_slice %7 {offsets = [24, 0], sizes = [20, 48], strides = [1, 1]} : vector<48x48xf32> to vector<20x48xf32>
    %79 = vector.extract_strided_slice %8 {offsets = [0, 0, 0], sizes = [1, 48, 40], strides = [1, 1, 1]} : vector<5x48x40xf32> to vector<1x48x40xf32>
    %80 = vector.shape_cast %79 : vector<1x48x40xf32> to vector<48x40xf32>
    %cst_38 = arith.constant dense<0.000000e+00> : vector<20x40xf32>
    %81 = tpu.matmul %78, %80, %cst_38 {dimension_numbers = #tpu.dot_dimension_numbers<[1], [0], [0], [1], [0, 0, 1, 1], [], []>} : vector<20x48xf32>, vector<48x40xf32>, vector<20x40xf32> -> vector<20x40xf32>
    %82 = vector.extract_strided_slice %7 {offsets = [25, 0], sizes = [20, 48], strides = [1, 1]} : vector<48x48xf32> to vector<20x48xf32>
    %83 = vector.extract_strided_slice %8 {offsets = [1, 0, 0], sizes = [1, 48, 40], strides = [1, 1, 1]} : vector<5x48x40xf32> to vector<1x48x40xf32>
    %84 = vector.shape_cast %83 : vector<1x48x40xf32> to vector<48x40xf32>
    %cst_39 = arith.constant dense<0.000000e+00> : vector<20x40xf32>
    %85 = tpu.matmul %82, %84, %cst_39 {dimension_numbers = #tpu.dot_dimension_numbers<[1], [0], [0], [1], [0, 0, 1, 1], [], []>} : vector<20x48xf32>, vector<48x40xf32>, vector<20x40xf32> -> vector<20x40xf32>
    %86 = arith.addf %81, %85 : vector<20x40xf32>
    %87 = vector.extract_strided_slice %7 {offsets = [26, 0], sizes = [20, 48], strides = [1, 1]} : vector<48x48xf32> to vector<20x48xf32>
    %88 = vector.extract_strided_slice %8 {offsets = [2, 0, 0], sizes = [1, 48, 40], strides = [1, 1, 1]} : vector<5x48x40xf32> to vector<1x48x40xf32>
    %89 = vector.shape_cast %88 : vector<1x48x40xf32> to vector<48x40xf32>
    %cst_40 = arith.constant dense<0.000000e+00> : vector<20x40xf32>
    %90 = tpu.matmul %87, %89, %cst_40 {dimension_numbers = #tpu.dot_dimension_numbers<[1], [0], [0], [1], [0, 0, 1, 1], [], []>} : vector<20x48xf32>, vector<48x40xf32>, vector<20x40xf32> -> vector<20x40xf32>
    %91 = arith.addf %86, %90 : vector<20x40xf32>
    %92 = vector.extract_strided_slice %7 {offsets = [27, 0], sizes = [20, 48], strides = [1, 1]} : vector<48x48xf32> to vector<20x48xf32>
    %93 = vector.extract_strided_slice %8 {offsets = [3, 0, 0], sizes = [1, 48, 40], strides = [1, 1, 1]} : vector<5x48x40xf32> to vector<1x48x40xf32>
    %94 = vector.shape_cast %93 : vector<1x48x40xf32> to vector<48x40xf32>
    %cst_41 = arith.constant dense<0.000000e+00> : vector<20x40xf32>
    %95 = tpu.matmul %92, %94, %cst_41 {dimension_numbers = #tpu.dot_dimension_numbers<[1], [0], [0], [1], [0, 0, 1, 1], [], []>} : vector<20x48xf32>, vector<48x40xf32>, vector<20x40xf32> -> vector<20x40xf32>
    %96 = arith.addf %91, %95 : vector<20x40xf32>
    %97 = vector.extract_strided_slice %7 {offsets = [28, 0], sizes = [20, 48], strides = [1, 1]} : vector<48x48xf32> to vector<20x48xf32>
    %98 = vector.extract_strided_slice %8 {offsets = [4, 0, 0], sizes = [1, 48, 40], strides = [1, 1, 1]} : vector<5x48x40xf32> to vector<1x48x40xf32>
    %99 = vector.shape_cast %98 : vector<1x48x40xf32> to vector<48x40xf32>
    %cst_42 = arith.constant dense<0.000000e+00> : vector<20x40xf32>
    %100 = tpu.matmul %97, %99, %cst_42 {dimension_numbers = #tpu.dot_dimension_numbers<[1], [0], [0], [1], [0, 0, 1, 1], [], []>} : vector<20x48xf32>, vector<48x40xf32>, vector<20x40xf32> -> vector<20x40xf32>
    %101 = arith.addf %96, %100 : vector<20x40xf32>
    %102 = vector.broadcast %9 : vector<1x40xf32> to vector<20x40xf32>
    %103 = arith.addf %101, %102 : vector<20x40xf32>
    %cst_43 = arith.constant 0.000000e+00 : f32
    %104 = vector.broadcast %cst_43 : f32 to vector<20x40xf32>
    %105 = arith.maximumf %103, %104 : vector<20x40xf32>
    %106 = vector.extract_strided_slice %105 {offsets = [0, 0], sizes = [1, 40], strides = [1, 1]} : vector<20x40xf32> to vector<1x40xf32>
    %c1 = arith.constant 1 : index
    %c0_44 = arith.constant 0 : index
    %107 = vector.load %arg10[%c1, %c0_44] : memref<2x800xf32, #tpu.memory_space<vmem>>, vector<1x40xf32>
    tpu.vector_store %arg10[%c1, %c0_44], %106 {strides = array<i32>} : memref<2x800xf32, #tpu.memory_space<vmem>>, vector<1x40xf32>,
    %108 = vector.extract_strided_slice %105 {offsets = [1, 0], sizes = [1, 40], strides = [1, 1]} : vector<20x40xf32> to vector<1x40xf32>
    %c1_45 = arith.constant 1 : index
    %c40_46 = arith.constant 40 : index
    %109 = vector.load %arg10[%c1_45, %c40_46] : memref<2x800xf32, #tpu.memory_space<vmem>>, vector<1x40xf32>
    tpu.vector_store %arg10[%c1_45, %c40_46], %108 {strides = array<i32>} : memref<2x800xf32, #tpu.memory_space<vmem>>, vector<1x40xf32>,
    %110 = vector.extract_strided_slice %105 {offsets = [2, 0], sizes = [1, 40], strides = [1, 1]} : vector<20x40xf32> to vector<1x40xf32>
    %c1_47 = arith.constant 1 : index
    %c80_48 = arith.constant 80 : index
    %111 = vector.load %arg10[%c1_47, %c80_48] : memref<2x800xf32, #tpu.memory_space<vmem>>, vector<1x40xf32>
    tpu.vector_store %arg10[%c1_47, %c80_48], %110 {strides = array<i32>} : memref<2x800xf32, #tpu.memory_space<vmem>>, vector<1x40xf32>,
    %112 = vector.extract_strided_slice %105 {offsets = [3, 0], sizes = [1, 40], strides = [1, 1]} : vector<20x40xf32> to vector<1x40xf32>
    %c1_49 = arith.constant 1 : index
    %c120_50 = arith.constant 120 : index
    %113 = vector.load %arg10[%c1_49, %c120_50] : memref<2x800xf32, #tpu.memory_space<vmem>>, vector<1x40xf32>
    tpu.vector_store %arg10[%c1_49, %c120_50], %112 {strides = array<i32>} : memref<2x800xf32, #tpu.memory_space<vmem>>, vector<1x40xf32>,
    %114 = vector.extract_strided_slice %105 {offsets = [4, 0], sizes = [1, 40], strides = [1, 1]} : vector<20x40xf32> to vector<1x40xf32>
    %c1_51 = arith.constant 1 : index
    %c160_52 = arith.constant 160 : index
    %115 = vector.load %arg10[%c1_51, %c160_52] : memref<2x800xf32, #tpu.memory_space<vmem>>, vector<1x40xf32>
    tpu.vector_store %arg10[%c1_51, %c160_52], %114 {strides = array<i32>} : memref<2x800xf32, #tpu.memory_space<vmem>>, vector<1x40xf32>,
    %116 = vector.extract_strided_slice %105 {offsets = [5, 0], sizes = [1, 40], strides = [1, 1]} : vector<20x40xf32> to vector<1x40xf32>
    %c1_53 = arith.constant 1 : index
    %c200_54 = arith.constant 200 : index
    %117 = vector.load %arg10[%c1_53, %c200_54] : memref<2x800xf32, #tpu.memory_space<vmem>>, vector<1x40xf32>
    tpu.vector_store %arg10[%c1_53, %c200_54], %116 {strides = array<i32>} : memref<2x800xf32, #tpu.memory_space<vmem>>, vector<1x40xf32>,
    %118 = vector.extract_strided_slice %105 {offsets = [6, 0], sizes = [1, 40], strides = [1, 1]} : vector<20x40xf32> to vector<1x40xf32>
    %c1_55 = arith.constant 1 : index
    %c240_56 = arith.constant 240 : index
    %119 = vector.load %arg10[%c1_55, %c240_56] : memref<2x800xf32, #tpu.memory_space<vmem>>, vector<1x40xf32>
    tpu.vector_store %arg10[%c1_55, %c240_56], %118 {strides = array<i32>} : memref<2x800xf32, #tpu.memory_space<vmem>>, vector<1x40xf32>,
    %120 = vector.extract_strided_slice %105 {offsets = [7, 0], sizes = [1, 40], strides = [1, 1]} : vector<20x40xf32> to vector<1x40xf32>
    %c1_57 = arith.constant 1 : index
    %c280_58 = arith.constant 280 : index
    %121 = vector.load %arg10[%c1_57, %c280_58] : memref<2x800xf32, #tpu.memory_space<vmem>>, vector<1x40xf32>
    tpu.vector_store %arg10[%c1_57, %c280_58], %120 {strides = array<i32>} : memref<2x800xf32, #tpu.memory_space<vmem>>, vector<1x40xf32>,
    %122 = vector.extract_strided_slice %105 {offsets = [8, 0], sizes = [1, 40], strides = [1, 1]} : vector<20x40xf32> to vector<1x40xf32>
    %c1_59 = arith.constant 1 : index
    %c320_60 = arith.constant 320 : index
    %123 = vector.load %arg10[%c1_59, %c320_60] : memref<2x800xf32, #tpu.memory_space<vmem>>, vector<1x40xf32>
    tpu.vector_store %arg10[%c1_59, %c320_60], %122 {strides = array<i32>} : memref<2x800xf32, #tpu.memory_space<vmem>>, vector<1x40xf32>,
    %124 = vector.extract_strided_slice %105 {offsets = [9, 0], sizes = [1, 40], strides = [1, 1]} : vector<20x40xf32> to vector<1x40xf32>
    %c1_61 = arith.constant 1 : index
    %c360_62 = arith.constant 360 : index
    %125 = vector.load %arg10[%c1_61, %c360_62] : memref<2x800xf32, #tpu.memory_space<vmem>>, vector<1x40xf32>
    tpu.vector_store %arg10[%c1_61, %c360_62], %124 {strides = array<i32>} : memref<2x800xf32, #tpu.memory_space<vmem>>, vector<1x40xf32>,
    %126 = vector.extract_strided_slice %105 {offsets = [10, 0], sizes = [1, 40], strides = [1, 1]} : vector<20x40xf32> to vector<1x40xf32>
    %c1_63 = arith.constant 1 : index
    %c400_64 = arith.constant 400 : index
    %127 = vector.load %arg10[%c1_63, %c400_64] : memref<2x800xf32, #tpu.memory_space<vmem>>, vector<1x40xf32>
    tpu.vector_store %arg10[%c1_63, %c400_64], %126 {strides = array<i32>} : memref<2x800xf32, #tpu.memory_space<vmem>>, vector<1x40xf32>,
    %128 = vector.extract_strided_slice %105 {offsets = [11, 0], sizes = [1, 40], strides = [1, 1]} : vector<20x40xf32> to vector<1x40xf32>
    %c1_65 = arith.constant 1 : index
    %c440_66 = arith.constant 440 : index
    %129 = vector.load %arg10[%c1_65, %c440_66] : memref<2x800xf32, #tpu.memory_space<vmem>>, vector<1x40xf32>
    tpu.vector_store %arg10[%c1_65, %c440_66], %128 {strides = array<i32>} : memref<2x800xf32, #tpu.memory_space<vmem>>, vector<1x40xf32>,
    %130 = vector.extract_strided_slice %105 {offsets = [12, 0], sizes = [1, 40], strides = [1, 1]} : vector<20x40xf32> to vector<1x40xf32>
    %c1_67 = arith.constant 1 : index
    %c480_68 = arith.constant 480 : index
    %131 = vector.load %arg10[%c1_67, %c480_68] : memref<2x800xf32, #tpu.memory_space<vmem>>, vector<1x40xf32>
    tpu.vector_store %arg10[%c1_67, %c480_68], %130 {strides = array<i32>} : memref<2x800xf32, #tpu.memory_space<vmem>>, vector<1x40xf32>,
    %132 = vector.extract_strided_slice %105 {offsets = [13, 0], sizes = [1, 40], strides = [1, 1]} : vector<20x40xf32> to vector<1x40xf32>
    %c1_69 = arith.constant 1 : index
    %c520_70 = arith.constant 520 : index
    %133 = vector.load %arg10[%c1_69, %c520_70] : memref<2x800xf32, #tpu.memory_space<vmem>>, vector<1x40xf32>
    tpu.vector_store %arg10[%c1_69, %c520_70], %132 {strides = array<i32>} : memref<2x800xf32, #tpu.memory_space<vmem>>, vector<1x40xf32>,
    %134 = vector.extract_strided_slice %105 {offsets = [14, 0], sizes = [1, 40], strides = [1, 1]} : vector<20x40xf32> to vector<1x40xf32>
    %c1_71 = arith.constant 1 : index
    %c560_72 = arith.constant 560 : index
    %135 = vector.load %arg10[%c1_71, %c560_72] : memref<2x800xf32, #tpu.memory_space<vmem>>, vector<1x40xf32>
    tpu.vector_store %arg10[%c1_71, %c560_72], %134 {strides = array<i32>} : memref<2x800xf32, #tpu.memory_space<vmem>>, vector<1x40xf32>,
    %136 = vector.extract_strided_slice %105 {offsets = [15, 0], sizes = [1, 40], strides = [1, 1]} : vector<20x40xf32> to vector<1x40xf32>
    %c1_73 = arith.constant 1 : index
    %c600_74 = arith.constant 600 : index
    %137 = vector.load %arg10[%c1_73, %c600_74] : memref<2x800xf32, #tpu.memory_space<vmem>>, vector<1x40xf32>
    tpu.vector_store %arg10[%c1_73, %c600_74], %136 {strides = array<i32>} : memref<2x800xf32, #tpu.memory_space<vmem>>, vector<1x40xf32>,
    %138 = vector.extract_strided_slice %105 {offsets = [16, 0], sizes = [1, 40], strides = [1, 1]} : vector<20x40xf32> to vector<1x40xf32>
    %c1_75 = arith.constant 1 : index
    %c640_76 = arith.constant 640 : index
    %139 = vector.load %arg10[%c1_75, %c640_76] : memref<2x800xf32, #tpu.memory_space<vmem>>, vector<1x40xf32>
    tpu.vector_store %arg10[%c1_75, %c640_76], %138 {strides = array<i32>} : memref<2x800xf32, #tpu.memory_space<vmem>>, vector<1x40xf32>,
    %140 = vector.extract_strided_slice %105 {offsets = [17, 0], sizes = [1, 40], strides = [1, 1]} : vector<20x40xf32> to vector<1x40xf32>
    %c1_77 = arith.constant 1 : index
    %c680_78 = arith.constant 680 : index
    %141 = vector.load %arg10[%c1_77, %c680_78] : memref<2x800xf32, #tpu.memory_space<vmem>>, vector<1x40xf32>
    tpu.vector_store %arg10[%c1_77, %c680_78], %140 {strides = array<i32>} : memref<2x800xf32, #tpu.memory_space<vmem>>, vector<1x40xf32>,
    %142 = vector.extract_strided_slice %105 {offsets = [18, 0], sizes = [1, 40], strides = [1, 1]} : vector<20x40xf32> to vector<1x40xf32>
    %c1_79 = arith.constant 1 : index
    %c720_80 = arith.constant 720 : index
    %143 = vector.load %arg10[%c1_79, %c720_80] : memref<2x800xf32, #tpu.memory_space<vmem>>, vector<1x40xf32>
    tpu.vector_store %arg10[%c1_79, %c720_80], %142 {strides = array<i32>} : memref<2x800xf32, #tpu.memory_space<vmem>>, vector<1x40xf32>,
    %144 = vector.extract_strided_slice %105 {offsets = [19, 0], sizes = [1, 40], strides = [1, 1]} : vector<20x40xf32> to vector<1x40xf32>
    %c1_81 = arith.constant 1 : index
    %c760_82 = arith.constant 760 : index
    %145 = vector.load %arg10[%c1_81, %c760_82] : memref<2x800xf32, #tpu.memory_space<vmem>>, vector<1x40xf32>
    tpu.vector_store %arg10[%c1_81, %c760_82], %144 {strides = array<i32>} : memref<2x800xf32, #tpu.memory_space<vmem>>, vector<1x40xf32>,
    %c0_83 = arith.constant 0 : index
    %c0_84 = arith.constant 0 : index
    %146 = vector.load %arg10[%c0_83, %c0_84] : memref<2x800xf32, #tpu.memory_space<vmem>>, vector<2x800xf32>
    %c0_85 = arith.constant 0 : index
    %c0_86 = arith.constant 0 : index
    %147 = vector.load %arg5[%c0_85, %c0_86] : memref<800x16xf32, #tpu.memory_space<vmem>>, vector<800x16xf32>
    %cst_87 = arith.constant dense<0.000000e+00> : vector<2x16xf32>
    %148 = tpu.matmul %146, %147, %cst_87 {dimension_numbers = #tpu.dot_dimension_numbers<[1], [0], [0], [1], [0, 0, 1, 1], [], []>} : vector<2x800xf32>, vector<800x16xf32>, vector<2x16xf32> -> vector<2x16xf32>
    %c0_88 = arith.constant 0 : index
    %c0_89 = arith.constant 0 : index
    %149 = vector.load %arg6[%c0_88, %c0_89] : memref<1x16xf32, #tpu.memory_space<vmem>>, vector<1x16xf32>
    %150 = vector.broadcast %149 : vector<1x16xf32> to vector<2x16xf32>
    %151 = arith.addf %148, %150 : vector<2x16xf32>
    %cst_90 = arith.constant 0.000000e+00 : f32
    %152 = vector.broadcast %cst_90 : f32 to vector<2x16xf32>
    %153 = arith.maximumf %151, %152 : vector<2x16xf32>
    %c0_91 = arith.constant 0 : index
    %c0_92 = arith.constant 0 : index
    %154 = vector.load %arg7[%c0_91, %c0_92] : memref<16x10xf32, #tpu.memory_space<vmem>>, vector<16x10xf32>
    %cst_93 = arith.constant dense<0.000000e+00> : vector<2x10xf32>
    %155 = tpu.matmul %153, %154, %cst_93 {dimension_numbers = #tpu.dot_dimension_numbers<[1], [0], [0], [1], [0, 0, 1, 1], [], []>} : vector<2x16xf32>, vector<16x10xf32>, vector<2x10xf32> -> vector<2x10xf32>
    %c0_94 = arith.constant 0 : index
    %c0_95 = arith.constant 0 : index
    %156 = vector.load %arg8[%c0_94, %c0_95] : memref<1x10xf32, #tpu.memory_space<vmem>>, vector<1x10xf32>
    %157 = vector.broadcast %156 : vector<1x10xf32> to vector<2x10xf32>
    %158 = arith.addf %155, %157 : vector<2x10xf32>
    %c0_96 = arith.constant 0 : index
    %c0_97 = arith.constant 0 : index
    %159 = vector.load %arg9[%c0_96, %c0_97] : memref<2x10xf32, #tpu.memory_space<vmem>>, vector<2x10xf32>
    tpu.vector_store %arg9[%c0_96, %c0_97], %158 {strides = array<i32>} : memref<2x10xf32, #tpu.memory_space<vmem>>, vector<2x10xf32>,
    return
  }
}

</mosaic_0001>

<bundles_post_ra>
// kernel: net_forward.1
= control target key start
LH: loop header
LB: loop body
LE: loop exit
PB: predicated region body
PF: predicated region fallthrough
CT: control target
= control target key end

     0   :  { %vm86_vm0 = vcmask 1043456   ;;  %vm67_vm1 = vcmask 97280   ;;  %s2237_s0 = inlined_call_operand.vmem [shape: f32[48,140], index: 0, kind: input, shape index: {}]   ;;  %s2238_s1 = inlined_call_operand.vmem [shape: f32[140,48], index: 1, kind: input, shape index: {}]   ;;  %s2239_s2 = inlined_call_operand.vmem [shape: f32[1,48], index: 2, kind: input, shape index: {}]   ;;  %s2240_s3 = inlined_call_operand.vmem [shape: f32[5,48,40], index: 3, kind: input, shape index: {}]   ;;  %s2241_s4 = inlined_call_operand.vmem [shape: f32[1,40], index: 4, kind: input, shape index: {}]   ;;  %s2242_s5 = inlined_call_operand.vmem [shape: f32[800,16], index: 5, kind: input, shape index: {}]   ;;  %s2243_s6 = inlined_call_operand.vmem [shape: f32[1,16], index: 6, kind: input, shape index: {}]   ;;  %s2244_s7 = inlined_call_operand.vmem [shape: f32[16,10], index: 7, kind: input, shape index: {}]   ;;  %s2245_s8 = inlined_call_operand.vmem [shape: f32[1,10], index: 8, kind: input, shape index: {}]   ;;  %s2246_s9 = inlined_call_operand.hbm [shape: f32[2,10], index: 9, kind: output, shape index: {}]  }
   0x1   :  { %v60_v0 = vld [vmem:[%s2238_s1 + $0x78] sm:$0xff]  ;;  %v59_v1 = vld [vmem:[%s2238_s1 + $0x70] sm:$0xff]  ;;  %v58_v2 = vld [vmem:[%s2238_s1 + $0x68] sm:$0xff] }
   0x2   :  { %90 = vmatpush.msra.mxu0 %v60_v0  ;;  %v57_v3 = vld [vmem:[%s2238_s1 + $0x60] sm:$0xff]  ;;  %v62_v4 = vld [vmem:[%s2238_s1 + $0x88] sm:$0xf]  ;;  %v56_v5 = vld [vmem:[%s2238_s1 + $0x58] sm:$0xff] }
   0x3   :  { %1242 = vmatpush.msk.msra.mxu1 %vm86_vm0, %v62_v4  ;;  %v61_v6 = vld [vmem:[%s2238_s1 + $0x80] sm:$0xff]  ;;  %v34_v7 = vld [vmem:[%s2237_s0 + $0x8] sm:$0xff]  ;;  %1301 = vmatpush.msk.msra.mxu2 %vm86_vm0, %v62_v4  ;;  %v55_v8 = vld [vmem:[%s2238_s1 + $0x50] sm:$0xff] }
   0x4   :  { %91 = vmatpush.msra.mxu0 %v59_v1 }
   0x5   :  { %140 = vmatpush.msra.mxu1 %v61_v6  ;;  %1302 = vmatpush.msra.mxu2 %v61_v6 }
   0x6   :  { %92 = vmatpush.msra.mxu0 %v58_v2  ;;  %1243 = vmatmul.msk.f32.vlgmr.msra.gmra.mxu1 %vm67_vm1, %v34_v7 }
   0x8   :  { %93 = vmatpush.msra.mxu0 %v57_v3 }
   0xa   :  { %94 = vmatpush.msra.mxu0 %v56_v5 }
   0xb   :  { %14 = vsyncpa [#allocation4], 0  ;;  %v54_v9 = vld [vmem:[%s2238_s1 + $0x48] sm:$0xff]  ;;  %v53_v10 = vld [vmem:[%s2238_s1 + $0x40] sm:$0xff]  ;;  %vm206_vm2 = vcmask 392192   ;;  %vm200_vm3 = vcmask 1046528  }
   0xc   :  { %95 = vmatpush.msra.mxu0 %v55_v8  ;;  %v52_v11 = vld [vmem:[%s2238_s1 + $0x38] sm:$0xff]  ;;  %v51_v13 = vld [vmem:[%s2238_s1 + $0x30] sm:$0xff]  ;;  %v50_v14 = vld [vmem:[%s2238_s1 + $0x28] sm:$0xff]  ;;  %vm312_vm4 = vcmask 1044480   ;;  %vm271_vm5 = vcmask 1045504   ;;  %vm402_vm6 = vcmask 319488  }
   0xd   :  { %v36_v12 = vld [vmem:[%s2237_s0 + $0x18] sm:$0xff]  ;;  %v49_v15 = vld [vmem:[%s2238_s1 + $0x20] sm:$0xff]  ;;  %v38_v17 = vld [vmem:[%s2237_s0 + $0x28] sm:$0xff]  ;;  %s1350_s19 = smov 80   ;;  %s1351_s20 = smov 64   ;;  %vm410_vm7 = vcmask 647488  }
   0xe   :  { %96 = vmatpush.msra.mxu0 %v54_v9  ;;  %1244 = vmatmul.msk.f32.gmra.mxu1 %vm67_vm1, %v36_v12  ;;  %v48_v16 = vld [vmem:[%s2238_s1 + $0x18] sm:$0xff]  ;;  %v47_v18 = vld [vmem:[%s2238_s1 + $0x10] sm:$0xff]  ;;  %v46_v19 = vld [vmem:[%s2238_s1 + $0x8] sm:$0xff]  ;;  %s1352_s21 = smov 104   ;;  %s1353_s22 = smov 120   ;;  %vm418_vm8 = vcmask 975488  }
   0xf   :  { %v45_v20 = vld [vmem:[%s2238_s1] sm:$0xff]  ;;  %v40_v22 = vld [vmem:[%s2237_s0 + $0x38] sm:$0xff]  ;;  %v35_v24 = vld [vmem:[%s2237_s0 + $0x10] sm:$0xff]  ;;  %s1354_s23 = smov 32   ;;  %s1355_s24 = smov 72   ;;  %vm431_vm9 = vcmask 1041344  }
  0x10   :  { %97 = vmatpush.msra.mxu0 %v53_v10  ;;  %v33_v21 = vld [vmem:[%s2237_s0] sm:$0xff]  ;;  %v44_v23 = vld [vmem:[%s2237_s0 + $0x58] sm:$0xff]  ;;  %v42_v25 = vld [vmem:[%s2237_s0 + $0x48] sm:$0xff]  ;;  %s1356_s25 = smov 112   ;;  %s1357_s26 = smov 24   ;;  %vm432_vm10 = vcmask 256002  }
  0x11   :  { %1248 = vmatmul.msk.f32.vlgmr.msra.gmra.mxu2 %vm67_vm1, %v44_v23  ;;  %v1503_v26 = vld [vmem:[%s2240_s3 + $0x28] sm:$0xff]  ;;  %v1508_v27 = vld [vmem:[%s2240_s3 + $0x20] sm:$0xff]  ;;  %v39_v29 = vld [vmem:[%s2237_s0 + $0x30] sm:$0xff]  ;;  %s1358_s27 = smov 16   ;;  %s1359_s28 = smov 56   ;;  %vm428_vm11 = vcmask 982016  }
  0x12   :  { %98 = vmatpush.msra.mxu0 %v52_v11  ;;  %255 = vmatpush.msra.mxu3 %v1503_v26  ;;  %v37_v28 = vld [vmem:[%s2237_s0 + $0x20] sm:$0xff]  ;;  %v43_v31 = vld [vmem:[%s2237_s0 + $0x50] sm:$0xff]  ;;  %v1528_v32 = vld [vmem:[%s2240_s3 + $0x18] sm:$0xff]  ;;  %s1360_s29 = smov 96   ;;  %s1361_s30 = smov 8   ;;  %vm441_vm13 = vcmask 581888  }
  0x13   :  { %v41_v30 = vld [vmem:[%s2237_s0 + $0x40] sm:$0xff]  ;;  %v1534_v33 = vld [vmem:[%s2240_s3 + $0x10] sm:$0xff]  ;;  %v1540_v34 = vld [vmem:[%s2240_s3 + $0x8] sm:$0xff]  ;;  %vm451_vm14 = vcmask 909888   ;;  %vm462_vm15 = vcmask 1041280   ;;  %s1362_s10 = smov 48  }
  0x14   :  { %99 = vmatpush.msra.mxu0 %v51_v13  ;;  %256 = vmatpush.msra.mxu3 %v1508_v27  ;;  %v1546_v35 = vld [vmem:[%s2240_s3] sm:$0xff]  ;;  %v1551_v36 = vld [vmem:[%s2240_s3 + $0x58] sm:$0xff]  ;;  %v1558_v37 = vld [vmem:[%s2240_s3 + $0xe8] sm:$0xff]  ;;  %s1363_s11 = smov 88   ;;  %s1233_s13 = sshll.u32 %s2246_s9, 4  ;;  %s1234_s13 = int_to_ptr.hbm [resolvable:$true] %s1233_s13 }
  0x15   :  { %223 = vmatpush.msrb.mxu2 %v1551_v36  ;;  %374 = vmatpush.msrb.mxu1 %v1558_v37  ;;  %v1564_v38 = vld [vmem:[%s2240_s3 + $0x50] sm:$0xff]  ;;  %v1569_v39 = vld [vmem:[%s2240_s3 + $0xe0] sm:$0xff]  ;;  %v1576_v40 = vld [vmem:[%s2240_s3 + $0x48] sm:$0xff] }
  0x16   :  { %100 = vmatpush.msra.mxu0 %v50_v14  ;;  %1245 = vmatmul.msk.f32.gmra.mxu1 %vm67_vm1, %v38_v17  ;;  %v1581_v41 = vld [vmem:[%s2240_s3 + $0xd8] sm:$0xff]  ;;  %v1588_v42 = vld [vmem:[%s2240_s3 + $0x40] sm:$0xff]  ;;  %v1593_v43 = vld [vmem:[%s2240_s3 + $0xd0] sm:$0xff] }
  0x17   :  { %257 = vmatpush.msra.mxu3 %v1528_v32  ;;  %224 = vmatpush.msrb.mxu2 %v1564_v38  ;;  %v1600_v44 = vld [vmem:[%s2240_s3 + $0x38] sm:$0xff]  ;;  %v1605_v45 = vld [vmem:[%s2240_s3 + $0xc8] sm:$0xff]  ;;  %v1612_v46 = vld [vmem:[%s2240_s3 + $0x30] sm:$0xff] }
  0x18   :  { %101 = vmatpush.msra.mxu0 %v49_v15  ;;  %375 = vmatpush.msrb.mxu1 %v1569_v39  ;;  %v1617_v47 = vld [vmem:[%s2240_s3 + $0xc0] sm:$0xff]  ;;  %v189_v48 = vld [vmem:[%s2240_s3 + $0xb8] sm:$0xff]  ;;  %v183_v49 = vld [vmem:[%s2240_s3 + $0x88] sm:$0xff] }
  0x19   :  { %258 = vmatpush.msra.mxu3 %v1534_v33  ;;  %225 = vmatpush.msrb.mxu2 %v1576_v40  ;;  %v182_v50 = vld [vmem:[%s2240_s3 + $0x80] sm:$0xff]  ;;  %v188_v51 = vld [vmem:[%s2240_s3 + $0xb0] sm:$0xff]  ;;  %v187_v52 = vld [vmem:[%s2240_s3 + $0xa8] sm:$0xff] }
  0x1a   :  { %102 = vmatpush.msra.mxu0 %v48_v16  ;;  %376 = vmatpush.msrb.mxu1 %v1581_v41  ;;  %v186_v53 = vld [vmem:[%s2240_s3 + $0xa0] sm:$0xff]  ;;  %v181_v54 = vld [vmem:[%s2240_s3 + $0x78] sm:$0xff]  ;;  %v180_v56 = vld [vmem:[%s2240_s3 + $0x70] sm:$0xff] }
  0x1b   :  { %259 = vmatpush.msra.mxu3 %v1540_v34  ;;  %226 = vmatpush.msrb.mxu2 %v1588_v42  ;;  %v185_v55 = vld [vmem:[%s2240_s3 + $0x98] sm:$0xff]  ;;  %v184_v57 = vld [vmem:[%s2240_s3 + $0x90] sm:$0xff]  ;;  %v1654_v59 = vld [vmem:[%s2239_s2] ss:$0 sm:$0xff] }
  0x1c   :  { %103 = vmatpush.msra.mxu0 %v47_v18  ;;  %377 = vmatpush.msrb.mxu1 %v1593_v43  ;;  %v179_v62 = vld [vmem:[%s2240_s3 + $0x68] sm:$0xff]  ;;  %v178_v63 = vld [vmem:[%s2240_s3 + $0x60] sm:$0xff]  ;;  %vm1817_vm12 = vmor %vm432_vm10, %vm431_vm9  ;;  %vm480_vm9 = vcmask 844288  }
  0x1d   :  { %260 = vmatpush.msra.mxu3 %v1546_v35  ;;  %227 = vmatpush.msrb.mxu2 %v1600_v44 }
  0x1e   :  { %104 = vmatpush.msra.mxu0 %v46_v19  ;;  %1246 = vmatmul.msk.f32.gmra.mxu1 %vm67_vm1, %v40_v22 }
  0x1f   :  { %378 = vmatpush.msrb.mxu1 %v1605_v45  ;;  %228 = vmatpush.msrb.mxu2 %v1612_v46 }
  0x20   :  { %105 = vmatpush.msra.mxu0 %v45_v20  ;;  %334 = vmatpush.msrb.mxu3 %v189_v48 }
  0x21   :  { %106 = vmatmul.f32.vlgmr.msra.gmra.mxu0 %v33_v21  ;;  %379 = vmatpush.msrb.mxu1 %v1617_v47 }
  0x22   :  { %712 = vmatpush.msrb.mxu0 %v189_v48  ;;  %293 = vmatpush.msra.mxu2 %v183_v49 }
  0x23   :  { %335 = vmatpush.msrb.mxu3 %v188_v51  ;;  %672 = vmatpush.msra.mxu1 %v183_v49 }
  0x24   :  { %713 = vmatpush.msrb.mxu0 %v188_v51  ;;  %294 = vmatpush.msra.mxu2 %v182_v50 }
  0x25   :  { %336 = vmatpush.msrb.mxu3 %v187_v52  ;;  %673 = vmatpush.msra.mxu1 %v182_v50 }
  0x26   :  { %1247 = vmatmul.msk.f32.gmra.mxu1 %vm67_vm1, %v42_v25  ;;  %714 = vmatpush.msrb.mxu0 %v187_v52  ;;  %vm459_vm1 = vcmask 916480  }
  0x27   :  { %337 = vmatpush.msrb.mxu3 %v186_v53  ;;  %295 = vmatpush.msra.mxu2 %v181_v54 }
  0x28   :  { %674 = vmatpush.msra.mxu1 %v181_v54  ;;  %715 = vmatpush.msrb.mxu0 %v186_v53 }
  0x29   :  { %109 = vmatmul.f32.gmra.mxu0 %v35_v24  ;;  %338 = vmatpush.msrb.mxu3 %v185_v55 }
  0x2a   :  { %296 = vmatpush.msra.mxu2 %v180_v56  ;;  %675 = vmatpush.msra.mxu1 %v180_v56 }
  0x2b   :  { %339 = vmatpush.msrb.mxu3 %v184_v57  ;;  %716 = vmatpush.msrb.mxu0 %v185_v55 }
  0x2c   :  { %297 = vmatpush.msra.mxu2 %v179_v62  ;;  %676 = vmatpush.msra.mxu1 %v179_v62 }
  0x2d   :  { %717 = vmatpush.msrb.mxu0 %v184_v57 }
  0x2e   :  { %298 = vmatpush.msra.mxu2 %v178_v63  ;;  %677 = vmatpush.msra.mxu1 %v178_v63 }
  0x31   :  { %112 = vmatmul.f32.gmra.mxu0 %v37_v28 }
  0x39   :  { %115 = vmatmul.f32.gmra.mxu0 %v39_v29 }
  0x41   :  { %118 = vmatmul.f32.gmra.mxu0 %v41_v30 }
  0x49   :  { %121 = vmatmul.f32.gmra.mxu0 %v43_v31 }
  0x83   :  { %v142_v58 = vpop.f32.mrf.mxu1 }
  0x8b   :  { %v145_v2 = vpop.f32.mrf.mxu1 }
  0x93   :  { %v148_v12 = vpop.f32.mrf.mxu1 }
  0x9b   :  { %v151_v29 = vpop.f32.mrf.mxu1 }
  0x9e   :  { %v107_v60 = vpop.f32.mrf.mxu0 }
  0x9f   :  { %v108_v61 = vadd.f32 %v1654_v59, %v107_v60 }
  0xa1   :  { %v143_v0 = vadd.f32 %v142_v58, %v108_v61 }
  0xa3   :  { %v160_v1 = vmax.f32 %v143_v0, 0.0 }
  0xa5   :  { %1252 = vmatmul.msk.f32.vlgmr.msra.gmra.mxu3 %vm206_vm2, %v160_v1  ;;  %v201_v7 = vrot.slane %v160_v1, 1  ;;  %v353_v9 = vrot.slane %v160_v1, 4  ;;  %v313_v23 = vrot.slane %v160_v1, 3  ;;  %v272_v30 = vrot.slane %v160_v1, 2 }
  0xa6   :  { %v110_v3 = vpop.f32.mrf.mxu0  ;;  %635 = vmatpush.msra.mxu3 %v1503_v26 }
  0xa7   :  { %v111_v4 = vadd.f32 %v1654_v59, %v110_v3 }
  0xa8   :  { %636 = vmatpush.msra.mxu3 %v1508_v27 }
  0xa9   :  { %v146_v5 = vadd.f32 %v145_v2, %v111_v4 }
  0xaa   :  { %637 = vmatpush.msra.mxu3 %v1528_v32 }
  0xab   :  { %v161_v6 = vmax.f32 %v146_v5, 0.0 }
  0xac   :  { %638 = vmatpush.msra.mxu3 %v1534_v33 }
  0xad   :  { %1253 = vmatmul.msk.f32.gmra.mxu3 %vm206_vm2, %v161_v6  ;;  %v202_v8 = vrot.slane %v161_v6, 1  ;;  %v354_v10 = vrot.slane %v161_v6, 4  ;;  %v314_v22 = vrot.slane %v161_v6, 3  ;;  %v273_v27 = vrot.slane %v161_v6, 2 }
  0xae   :  { %v113_v11 = vpop.f32.mrf.mxu0  ;;  %639 = vmatpush.msra.mxu3 %v1540_v34 }
  0xaf   :  { %v114_v13 = vadd.f32 %v1654_v59, %v113_v11  ;;  %v203_v14 = vsel %vm200_vm3, %v201_v7, %v202_v8  ;;  %v355_v15 = vsel %vm86_vm0, %v353_v9, %v354_v10  ;;  %v315_v24 = vsel %vm312_vm4, %v313_v23, %v314_v22 }
  0xb0   :  { %1249 = vmatmul.msk.f32.vlgmr.msrb.gmra.mxu2 %vm206_vm2, %v203_v14  ;;  %1261 = vmatmul.msk.f32.vlgmr.msrb.gmra.mxu1 %vm206_vm2, %v355_v15  ;;  %v274_v31 = vsel %vm271_vm5, %v272_v30, %v273_v27  ;;  %v1735_v15 = vld [vmem:[%s2241_s4] ss:$0 sm:$0xff]  ;;  %s1349_s4 = smov 40  }
  0xb1   :  { %v149_v16 = vadd.f32 %v148_v12, %v114_v13  ;;  %603 = vmatpush.msrb.mxu2 %v1551_v36  ;;  %640 = vmatpush.msra.mxu3 %v1546_v35  ;;  %v154_v36 = vpop.f32.mrf.mxu1 }
  0xb3   :  { %v162_v17 = vmax.f32 %v149_v16, 0.0  ;;  %604 = vmatpush.msrb.mxu2 %v1564_v38 }
  0xb5   :  { %1254 = vmatmul.msk.f32.gmra.mxu3 %vm206_vm2, %v162_v17  ;;  %v204_v18 = vrot.slane %v162_v17, 1  ;;  %v356_v19 = vrot.slane %v162_v17, 4  ;;  %605 = vmatpush.msrb.mxu2 %v1576_v40  ;;  %v316_v26 = vrot.slane %v162_v17, 3  ;;  %v275_v33 = vrot.slane %v162_v17, 2 }
  0xb6   :  { %v116_v25 = vpop.f32.mrf.mxu0 }
  0xb7   :  { %v205_v20 = vsel %vm200_vm3, %v202_v8, %v204_v18  ;;  %v357_v21 = vsel %vm86_vm0, %v354_v10, %v356_v19  ;;  %606 = vmatpush.msrb.mxu2 %v1588_v42  ;;  %v317_v28 = vsel %vm312_vm4, %v314_v22, %v316_v26  ;;  %v117_v34 = vadd.f32 %v1654_v59, %v116_v25 }
  0xb8   :  { %1250 = vmatmul.msk.f32.gmra.mxu2 %vm206_vm2, %v205_v20  ;;  %1262 = vmatmul.msk.f32.gmra.mxu1 %vm206_vm2, %v357_v21  ;;  %v276_v38 = vsel %vm271_vm5, %v273_v27, %v275_v33 }
  0xb9   :  { %607 = vmatpush.msrb.mxu2 %v1600_v44  ;;  %v152_v40 = vadd.f32 %v151_v29, %v117_v34 }
  0xbb   :  { %608 = vmatpush.msrb.mxu2 %v1612_v46  ;;  %v163_v44 = vmax.f32 %v152_v40, 0.0 }
  0xbd   :  { %1258 = vmatmul.msk.f32.vlgmr.msrb.gmra.mxu3 %vm206_vm2, %v315_v24  ;;  %v651_v48 = vrot.slane %v163_v44, 2  ;;  %v582_v52 = vrot.slane %v163_v44, 1  ;;  %v731_v62 = vrot.slane %v163_v44, 4 }
  0xbe   :  { %v119_v32 = vpop.f32.mrf.mxu0 }
  0xbf   :  { %v120_v35 = vadd.f32 %v1654_v59, %v119_v32 }
  0xc0   :  { %1251 = vmatmul.msk.f32.gmra.mxu2 %vm206_vm2, %v204_v18  ;;  %1263 = vmatmul.msk.f32.gmra.mxu1 %vm206_vm2, %v356_v19 }
  0xc5   :  { %1259 = vmatmul.msk.f32.gmra.mxu3 %vm206_vm2, %v317_v28 }
  0xc6   :  { %v122_v42 = vpop.f32.mrf.mxu0 }
  0xc7   :  { %v123_v46 = vadd.f32 %v1654_v59, %v122_v42 }
  0xc8   :  { %1255 = vmatmul.msk.f32.vlgmr.msra.gmra.mxu2 %vm206_vm2, %v274_v31 }
  0xc9   :  { %752 = vmatpush.msra.mxu2 %v1558_v37  ;;  %v155_v37 = vadd.f32 %v154_v36, %v120_v35 }
  0xcb   :  { %753 = vmatpush.msra.mxu2 %v1569_v39  ;;  %v164_v39 = vmax.f32 %v155_v37, 0.0 }
  0xcd   :  { %1260 = vmatmul.msk.f32.gmra.mxu3 %vm206_vm2, %v316_v26  ;;  %754 = vmatpush.msra.mxu2 %v1581_v41  ;;  %v157_v41 = vpop.f32.mrf.mxu2  ;;  %v652_v49 = vrot.slane %v164_v39, 2  ;;  %v692_v50 = vrot.slane %v164_v39, 3  ;;  %v583_v53 = vrot.slane %v164_v39, 1  ;;  %v732_v63 = vrot.slane %v164_v39, 4 }
  0xce   :  { %v158_v51 = vadd.f32 %v157_v41, %v123_v46 }
  0xcf   :  { %755 = vmatpush.msra.mxu2 %v1593_v43  ;;  %v691_v43 = vrot.slane %v163_v44, 3  ;;  %v584_v55 = vsel %vm200_vm3, %v582_v52, %v583_v53  ;;  %v733_v0 = vsel %vm86_vm0, %v731_v62, %v732_v63 }
  0xd0   :  { %1256 = vmatmul.msk.f32.gmra.mxu2 %vm206_vm2, %v276_v38 }
  0xd1   :  { %756 = vmatpush.msra.mxu2 %v1605_v45  ;;  %v653_v45 = vsel %vm271_vm5, %v651_v48, %v652_v49  ;;  %v693_v54 = vsel %vm312_vm4, %v691_v43, %v692_v50 }
  0xd2   :  { %1280 = vmatmul.msk.f32.vlgmr.msra.gmra.mxu1 %vm206_vm2, %v653_v45  ;;  %1283 = vmatmul.msk.f32.vlgmr.msrb.gmra.mxu0 %vm206_vm2, %v693_v54 }
  0xd3   :  { %757 = vmatpush.msra.mxu2 %v1617_v47  ;;  %v165_v47 = vmax.f32 %v158_v51, 0.0 }
  0xd5   :  { %1277 = vmatmul.msk.f32.vlgmr.msra.gmra.mxu3 %vm206_vm2, %v163_v44  ;;  %v654_v56 = vrot.slane %v165_v47, 2  ;;  %v694_v57 = vrot.slane %v165_v47, 3  ;;  %v585_v58 = vrot.slane %v165_v47, 1  ;;  %v734_v1 = vrot.slane %v165_v47, 4 }
  0xd7   :  { %v655_v59 = vsel %vm271_vm5, %v652_v49, %v654_v56  ;;  %v695_v60 = vsel %vm312_vm4, %v692_v50, %v694_v57  ;;  %v586_v61 = vsel %vm200_vm3, %v583_v53, %v585_v58  ;;  %v735_v2 = vsel %vm86_vm0, %v732_v63, %v734_v1 }
  0xd8   :  { %1257 = vmatmul.msk.f32.gmra.mxu2 %vm206_vm2, %v275_v33  ;;  %vm463_vm0 = vcmask 190466   ;;  %vm490_vm3 = vcmask 1041216   ;;  %vm491_vm4 = vcmask 124930   ;;  %vm474_vm5 = vcmask 516288  }
  0xd9   :  { %vm1842_vm10 = vmor %vm491_vm4, %vm490_vm3  ;;  %vm522_vm3 = vcmask 59394   ;;  %vm518_vm4 = vcmask 785408  }
  0xda   :  { %1281 = vmatmul.msk.f32.gmra.mxu1 %vm206_vm2, %v655_v59  ;;  %1284 = vmatmul.msk.f32.gmra.mxu0 %vm206_vm2, %v695_v60 }
  0xdd   :  { %1278 = vmatmul.msk.f32.gmra.mxu3 %vm206_vm2, %v164_v39 }
  0xe0   :  { %1274 = vmatmul.msk.f32.vlgmr.msrb.gmra.mxu2 %vm206_vm2, %v584_v55 }
  0xe2   :  { %1282 = vmatmul.msk.f32.gmra.mxu1 %vm206_vm2, %v654_v56  ;;  %1285 = vmatmul.msk.f32.gmra.mxu0 %vm206_vm2, %v694_v57 }
  0xe5   :  { %1279 = vmatmul.msk.f32.gmra.mxu3 %vm206_vm2, %v165_v47 }
  0xe8   :  { %1275 = vmatmul.msk.f32.gmra.mxu2 %vm206_vm2, %v586_v61 }
  0xf0   :  { %1276 = vmatmul.msk.f32.gmra.mxu2 %vm206_vm2, %v585_v58 }
  0xf8   :  { %1286 = vmatmul.msk.f32.vlgmr.msra.gmra.mxu2 %vm206_vm2, %v733_v0 }
 0x100   :  { %1287 = vmatmul.msk.f32.gmra.mxu2 %vm206_vm2, %v735_v2 }
 0x108   :  { %1288 = vmatmul.msk.f32.gmra.mxu2 %vm206_vm2, %v734_v1  ;;  %vm1835_vm2 = vmor %vm463_vm0, %vm462_vm15  ;;  %vm2247_vm15 = vcmask 450688   ;;  %vm510_vm0 = vcmask 778688  }
 0x128   :  { %v262_v3 = vpop.f32.mrf.mxu3 }
 0x12d   :  { %v381_v11 = vpop.f32.mrf.mxu1 }
 0x130   :  { %v265_v5 = vpop.f32.mrf.mxu3 }
 0x133   :  { %v230_v4 = vpop.f32.mrf.mxu2 }
 0x134   :  { %v263_v10 = vadd.f32 %v262_v3, %v230_v4 }
 0x135   :  { %v384_v23 = vpop.f32.mrf.mxu1 }
 0x138   :  { %v268_v7 = vpop.f32.mrf.mxu3 }
 0x13b   :  { %v233_v6 = vpop.f32.mrf.mxu2 }
 0x13c   :  { %v266_v17 = vadd.f32 %v265_v5, %v233_v6 }
 0x13d   :  { %v387_v36 = vpop.f32.mrf.mxu1 }
 0x140   :  { %v341_v9 = vpop.f32.mrf.mxu3 }
 0x143   :  { %v236_v8 = vpop.f32.mrf.mxu2 }
 0x144   :  { %v269_v27 = vadd.f32 %v268_v7, %v236_v8 }
 0x148   :  { %v344_v19 = vpop.f32.mrf.mxu3 }
 0x14b   :  { %v300_v12 = vpop.f32.mrf.mxu2 }
 0x14c   :  { %v309_v13 = vadd.f32 %v300_v12, %v263_v10 }
 0x14e   :  { %v350_v14 = vadd.f32 %v341_v9, %v309_v13 }
 0x14f   :  { %v679_v43 = vpop.f32.mrf.mxu1  ;;  %v719_v52 = vpop.f32.mrf.mxu0 }
 0x150   :  { %v390_v16 = vadd.f32 %v381_v11, %v350_v14  ;;  %v347_v33 = vpop.f32.mrf.mxu3 }
 0x152   :  { %v396_v18 = vadd.f32 %v1735_v15, %v390_v16 }
 0x153   :  { %v303_v20 = vpop.f32.mrf.mxu2 }
 0x154   :  { %v1738_v21 = vmax.f32 %v396_v18, 0.0  ;;  %v310_v22 = vadd.f32 %v303_v20, %v266_v17 }
 0x156   :  { %412 = vst.sshfl [vmem:[#allocation1] sm:$0xff pattern:$0x73625140] %v1738_v21  ;;  %v351_v24 = vadd.f32 %v344_v19, %v310_v22  ;;  %v1264_v25 = vrot.slane %v1738_v21, 9 }
 0x157   :  { %403 = vst.msk [vmem:[#allocation2] sm:$0x1] %vm402_vm6, %v1738_v21  ;;  %v682_v57 = vpop.f32.mrf.mxu1  ;;  %v722_v62 = vpop.f32.mrf.mxu0 }
 0x158   :  { %v391_v26 = vadd.f32 %v384_v23, %v351_v24  ;;  %407 = vrot.lane.b32.xlu1 %v1264_v25, %s1349_s4  ;;  %v642_v41 = vpop.f32.mrf.mxu3 }
 0x15a   :  { %v397_v28 = vadd.f32 %v1735_v15, %v391_v26 }
 0x15b   :  { %v306_v29 = vpop.f32.mrf.mxu2 }
 0x15c   :  { %v1746_v30 = vmax.f32 %v397_v28, 0.0  ;;  %v311_v31 = vadd.f32 %v306_v29, %v269_v27 }
 0x15d   :  { %v414_v32 = vld [vmem:[#allocation1 + $0x1] ss:$4 sm:$0xff] }
 0x15e   :  { %420 = vst.sshfl [vmem:[#allocation1] sm:$0xff pattern:$0x73625140] %v1738_v21  ;;  %v352_v34 = vadd.f32 %v347_v33, %v311_v31  ;;  %415 = vrot.lane.b32.xlu2 %v414_v32, %s1350_s19  ;;  %v1268_v35 = vrot.slane %v1746_v30, 9 }
 0x15f   :  { %v685_v4 = vpop.f32.mrf.mxu1  ;;  %v725_v10 = vpop.f32.mrf.mxu0 }
 0x160   :  { %v392_v38 = vadd.f32 %v387_v36, %v352_v34  ;;  %477 = vrot.lane.b32.xlu1 %v1746_v30, %s1351_s20  ;;  %484 = vrot.lane.b32.xlu0 %v1268_v35, %s1352_s21  ;;  %v645_v54 = vpop.f32.mrf.mxu3 }
 0x162   :  { %v398_v40 = vadd.f32 %v1735_v15, %v392_v38 }
 0x163   :  { %v610_v37 = vpop.f32.mrf.mxu2 }
 0x164   :  { %v1755_v42 = vmax.f32 %v398_v40, 0.0  ;;  %v643_v50 = vadd.f32 %v642_v41, %v610_v37 }
 0x165   :  { %v422_v44 = vld [vmem:[#allocation1 + $0x1] ss:$4 sm:$0xff] }
 0x166   :  { %435 = vst.sshfl [vmem:[#allocation1] sm:$0xff pattern:$0x73625140] %v1738_v21  ;;  %v1265_v39 = vrot.slane %v422_v44, 9  ;;  %v1272_v49 = vrot.slane %v1755_v42, 9  ;;  %v688_v53 = vadd.f32 %v679_v43, %v643_v50 }
 0x167   :  { %553 = vst.msk [vmem:[#allocation2 + $0xa] sm:$0x1] %vm402_vm6, %v1755_v42 }
 0x168   :  { %425 = vrot.lane.b32.xlu0 %v1265_v39, %s1353_s22  ;;  %v728_v55 = vadd.f32 %v719_v52, %v688_v53  ;;  %v648_v63 = vpop.f32.mrf.mxu3 }
 0x16b   :  { %v613_v46 = vpop.f32.mrf.mxu2 }
 0x16c   :  { %v646_v56 = vadd.f32 %v645_v54, %v613_v46  ;;  %v968_v54 = vld [vmem:[%s2242_s5 + $0x140] sm:$0xff] }
 0x16d   :  { %v437_v48 = vld [vmem:[#allocation1 + $0x2] ss:$4 sm:$0xff] }
 0x16e   :  { %443 = vst.sshfl [vmem:[#allocation1] sm:$0xff pattern:$0x73625140] %v1738_v21  ;;  %438 = vrot.lane.b32.xlu2 %v437_v48, %s1354_s23  ;;  %v689_v60 = vadd.f32 %v682_v57, %v646_v56 }
 0x170   :  { %557 = vrot.lane.b32.xlu0 %v1272_v49, %s1349_s4  ;;  %v729_v2 = vadd.f32 %v722_v62, %v689_v60 }
 0x173   :  { %v616_v51 = vpop.f32.mrf.mxu2 }
 0x174   :  { %v649_v3 = vadd.f32 %v648_v63, %v616_v51 }
 0x175   :  { %v445_v45 = vld [vmem:[#allocation1 + $0x2] ss:$4 sm:$0xff] }
 0x176   :  { %453 = vst.sshfl [vmem:[#allocation1] sm:$0xff pattern:$0x73625140] %v1738_v21  ;;  %v1266_v47 = vrot.slane %v445_v45, 9  ;;  %v690_v8 = vadd.f32 %v685_v4, %v649_v3 }
 0x178   :  { %448 = vrot.lane.b32.xlu1 %v1266_v47, %s1355_s24  ;;  %v730_v14 = vadd.f32 %v725_v10, %v690_v8 }
 0x17b   :  { %v759_v58 = vpop.f32.mrf.mxu2 }
 0x17c   :  { %v768_v59 = vadd.f32 %v759_v58, %v728_v55  ;;  %v980_v58 = vld [vmem:[%s2242_s5 + $0x1a0] sm:$0xff] }
 0x17d   :  { %v455_v61 = vld [vmem:[#allocation1 + $0x3] ss:$4 sm:$0xff] }
 0x17e   :  { %466 = vst.sshfl [vmem:[#allocation1] sm:$0xff pattern:$0x73625140] %v1738_v21  ;;  %456 = vrot.lane.b32.xlu0 %v455_v61, %s1356_s25  ;;  %v771_v0 = vadd.f32 %v1735_v15, %v768_v59 }
 0x180   :  { %v1770_v1 = vmax.f32 %v771_v0, 0.0 }
 0x182   :  { %v1289_v5 = vrot.slane %v1770_v1, 9  ;;  %777 = vst.msk [vmem:[#allocation2 + $0x1] sm:$0x1] %vm402_vm6, %v1770_v1 }
 0x183   :  { %v762_v6 = vpop.f32.mrf.mxu2 }
 0x184   :  { %v769_v7 = vadd.f32 %v762_v6, %v729_v2  ;;  %781 = vrot.lane.b32.xlu1 %v1289_v5, %s1349_s4 }
 0x185   :  { %v468_v9 = vld [vmem:[#allocation1 + $0x3] ss:$4 sm:$0xff] }
 0x186   :  { %494 = vst.sshfl [vmem:[#allocation1] sm:$0xff pattern:$0x73625140] %v1746_v30  ;;  %v772_v11 = vadd.f32 %v1735_v15, %v769_v7  ;;  %v1267_v12 = vrot.slane %v468_v9, 9  ;;  %v1020_v9 = vld [vmem:[%s2242_s5 + $0x2e0] sm:$0xff] }
 0x188   :  { %v1778_v13 = vmax.f32 %v772_v11, 0.0  ;;  %471 = vrot.lane.b32.xlu2 %v1267_v12, %s1357_s26 }
 0x18a   :  { %v1293_v16 = vrot.slane %v1778_v13, 9 }
 0x18b   :  { %v765_v17 = vpop.f32.mrf.mxu2 }
 0x18c   :  { %844 = vrot.lane.b32.xlu1 %v1293_v16, %s1352_s21  ;;  %v770_v18 = vadd.f32 %v765_v17, %v730_v14 }
 0x18d   :  { %v496_v19 = vld [vmem:[#allocation1 + $0x1] ss:$4 sm:$0xff] }
 0x18e   :  { %502 = vst.sshfl [vmem:[#allocation1] sm:$0xff pattern:$0x73625140] %v1746_v30  ;;  %v773_v20 = vadd.f32 %v1735_v15, %v770_v18 }
 0x190   :  { %838 = vrot.lane.b32.xlu2 %v1778_v13, %s1351_s20  ;;  %v1787_v21 = vmax.f32 %v773_v20, 0.0 }
 0x192   :  { %900 = vst.msk [vmem:[#allocation2 + $0xb] sm:$0x1] %vm402_vm6, %v1787_v21  ;;  %v1297_v15 = vrot.slane %v1787_v21, 9  ;;  %vm487_vm6 = vcmask 850944  }
 0x195   :  { %v504_v22 = vld [vmem:[#allocation1 + $0x1] ss:$4 sm:$0xff] }
 0x196   :  { %512 = vst.sshfl [vmem:[#allocation1] sm:$0xff pattern:$0x73625140] %v1746_v30  ;;  %v1269_v23 = vrot.slane %v504_v22, 9 }
 0x198   :  { %497 = vrot.lane.b32.xlu2 %v496_v19, %s1358_s27  ;;  %507 = vrot.lane.b32.xlu1 %v1269_v23, %s1359_s28 }
 0x19d   :  { %v514_v24 = vld [vmem:[#allocation1 + $0x2] ss:$4 sm:$0xff] }
 0x19e   :  { %525 = vst.sshfl [vmem:[#allocation1] sm:$0xff pattern:$0x73625140] %v1746_v30  ;;  %515 = vrot.lane.b32.xlu0 %v514_v24, %s1360_s29 }
 0x1a0   :  { %904 = vrot.lane.b32.xlu2 %v1297_v15, %s1349_s4 }
 0x1a5   :  { %v527_v25 = vld [vmem:[#allocation1 + $0x2] ss:$4 sm:$0xff] }
 0x1a6   :  { %535 = vst.sshfl [vmem:[#allocation1] sm:$0xff pattern:$0x73625140] %v1746_v30  ;;  %v1270_v26 = vrot.slane %v527_v25, 9 }
 0x1a8   :  { %530 = vrot.lane.b32.xlu2 %v1270_v26, %s1361_s30 }
 0x1ad   :  { %v1800_v27 = vld [vmem:[#allocation1 + $0x3] ss:$4 sm:$0xff] }
 0x1ae   :  { %543 = vst.sshfl [vmem:[#allocation1] sm:$0xff pattern:$0x73625140] %v1746_v30 }
 0x1b5   :  { %v1803_v28 = vld [vmem:[#allocation1 + $0x3] ss:$4 sm:$0xff] }
 0x1b6   :  { %561 = vst.sshfl [vmem:[#allocation1] sm:$0xff pattern:$0x73625140] %v1755_v42 }
 0x1b8   :  { %v416_v34 = vpop.permute.xlu2 %415 }
 0x1bd   :  { %v1806_v29 = vld [vmem:[#allocation1 + $0x1] ss:$4 sm:$0xff] }
 0x1be   :  { %568 = vst.sshfl [vmem:[#allocation1] sm:$0xff pattern:$0x73625140] %v1755_v42  ;;  %v1194_v42 = vld [vmem:[%s2244_s7] sm:$0xff] }
 0x1c5   :  { %v570_v31 = vld [vmem:[#allocation1 + $0x1] ss:$4 sm:$0xff] }
 0x1c6   :  { %v1273_v32 = vrot.slane %v570_v31, 9  ;;  %785 = vst.sshfl [vmem:[#allocation1] sm:$0xff pattern:$0x73625140] %v1770_v1 }
 0x1c8   :  { %573 = vrot.lane.b32.xlu0 %v1273_v32, %s1353_s22  ;;  %v439_v40 = vpop.permute.xlu2 %438  ;;  %v975_v32 = vld [vmem:[%s2242_s5 + $0x178] sm:$0xff] }
 0x1c9   :  { %1093 = vmatpush.msra.mxu0 %v975_v32 }
 0x1ca   :  { %v408_v33 = vpop.permute.xlu1 %407 }
 0x1cb   :  { %411 = vst.msk [vmem:[#allocation2] sm:$0x1] %vm410_vm7, %v408_v33  ;;  %v991_v33 = vld [vmem:[%s2242_s5 + $0x1f8] sm:$0xff] }
 0x1cc   :  { %419 = vst.msk [vmem:[#allocation2] sm:$0x1] %vm418_vm8, %v416_v34  ;;  %v942_v34 = vld [vmem:[%s2242_s5 + $0x70] sm:$0xff]  ;;  %1113 = vmatpush.msrb.mxu2 %v991_v33  ;;  %v945_v33 = vld [vmem:[%s2242_s5 + $0x88] sm:$0xff] }
 0x1cd   :  { %v787_v30 = vld [vmem:[#allocation1 + $0x1] ss:$4 sm:$0xff] }
 0x1ce   :  { %788 = vrot.lane.b32.xlu2 %v787_v30, %s1350_s19  ;;  %792 = vst.sshfl [vmem:[#allocation1] sm:$0xff pattern:$0x73625140] %v1770_v1  ;;  %v958_v30 = vld [vmem:[%s2242_s5 + $0xf0] sm:$0xff] }
 0x1d2   :  { %v485_v35 = vpop.permute.xlu0 %484  ;;  %v478_v41 = vpop.permute.xlu1 %477 }
 0x1d3   :  { %v486_v55 = vrot.slane %v485_v35, 6 }
 0x1d5   :  { %v794_v36 = vld [vmem:[#allocation1 + $0x1] ss:$4 sm:$0xff]  ;;  %v488_v59 = vsel %vm487_vm6, %v486_v55, %v485_v35 }
 0x1d6   :  { %v1290_v38 = vrot.slane %v794_v36, 9  ;;  %803 = vst.sshfl [vmem:[#allocation1] sm:$0xff pattern:$0x73625140] %v1770_v1  ;;  %v974_v35 = vld [vmem:[%s2242_s5 + $0x170] sm:$0xff] }
 0x1d7   :  { %v990_v36 = vld [vmem:[%s2242_s5 + $0x1f0] sm:$0xff]  ;;  %1094 = vmatpush.msra.mxu0 %v974_v35 }
 0x1d8   :  { %797 = vrot.lane.b32.xlu0 %v1290_v38, %s1353_s22  ;;  %1114 = vmatpush.msrb.mxu2 %v990_v36  ;;  %v941_v38 = vld [vmem:[%s2242_s5 + $0x68] sm:$0xff]  ;;  %v986_v55 = vld [vmem:[%s2242_s5 + $0x1d0] sm:$0xff]  ;;  %v928_v36 = vld [vmem:[%s2242_s5] sm:$0xff] }
 0x1da   :  { %v426_v37 = vpop.permute.xlu0 %425 }
 0x1db   :  { %v427_v44 = vrot.slane %v426_v37, 6 }
 0x1dd   :  { %v429_v39 = vsel %vm428_vm11, %v427_v44, %v426_v37  ;;  %v805_v46 = vld [vmem:[#allocation1 + $0x2] ss:$4 sm:$0xff] }
 0x1de   :  { %434 = vst.msk [vmem:[#allocation2] sm:$0x5] %vm1817_vm12, %v429_v39  ;;  %v973_v37 = vld [vmem:[%s2242_s5 + $0x168] sm:$0xff]  ;;  %v940_v39 = vld [vmem:[%s2242_s5 + $0x60] sm:$0xff] }
 0x1df   :  { %810 = vst.sshfl [vmem:[#allocation1] sm:$0xff pattern:$0x73625140] %v1770_v1  ;;  %v989_v44 = vld [vmem:[%s2242_s5 + $0x1e8] sm:$0xff]  ;;  %1095 = vmatpush.msra.mxu0 %v973_v37  ;;  %v976_v37 = vld [vmem:[%s2242_s5 + $0x180] sm:$0xff] }
 0x1e0   :  { %806 = vrot.lane.b32.xlu0 %v805_v46, %s1354_s23  ;;  %442 = vst.msk [vmem:[#allocation2 + $0x2] sm:$0x1] %vm441_vm13, %v439_v40  ;;  %v957_v40 = vld [vmem:[%s2242_s5 + $0xe8] sm:$0xff]  ;;  %v956_v46 = vld [vmem:[%s2242_s5 + $0xe0] sm:$0xff]  ;;  %1115 = vmatpush.msrb.mxu2 %v989_v44 }
 0x1e2   :  { %v472_v48 = vpop.permute.xlu2 %471  ;;  %v558_v49 = vpop.permute.xlu0 %557 }
 0x1e3   :  { %560 = vst.msk [vmem:[#allocation2 + $0xa] sm:$0x1] %vm410_vm7, %v558_v49  ;;  %v939_v49 = vld [vmem:[%s2242_s5 + $0x58] sm:$0xff] }
 0x1e6   :  { %v812_v43 = vld [vmem:[#allocation1 + $0x2] ss:$4 sm:$0xff] }
 0x1e7   :  { %v1291_v50 = vrot.slane %v812_v43, 9  ;;  %819 = vst.sshfl [vmem:[#allocation1] sm:$0xff pattern:$0x73625140] %v1770_v1  ;;  %v955_v43 = vld [vmem:[%s2242_s5 + $0xd8] sm:$0xff] }
 0x1e9   :  { %815 = vrot.lane.b32.xlu2 %v1291_v50, %s1355_s24  ;;  %v971_v50 = vld [vmem:[%s2242_s5 + $0x158] sm:$0xff] }
 0x1ea   :  { %v449_v51 = vpop.permute.xlu1 %448  ;;  %v1830_v52 = vpop.permute.xlu2 %838 }
 0x1eb   :  { %452 = vst.msk [vmem:[#allocation2 + $0x2] sm:$0x1] %vm451_vm14, %v449_v51  ;;  %v987_v51 = vld [vmem:[%s2242_s5 + $0x1d8] sm:$0xff] }
 0x1ee   :  { %v821_v53 = vld [vmem:[#allocation1 + $0x3] ss:$4 sm:$0xff] }
 0x1ef   :  { %822 = vrot.lane.b32.xlu1 %v821_v53, %s1356_s25  ;;  %828 = vst.sshfl [vmem:[#allocation1] sm:$0xff pattern:$0x73625140] %v1770_v1  ;;  %v938_v53 = vld [vmem:[%s2242_s5 + $0x50] sm:$0xff] }
 0x1f0   :  { %v457_v45 = vpop.permute.xlu0 %456 }
 0x1f1   :  { %v458_v47 = vrot.slane %v457_v45, 6 }
 0x1f2   :  { %v498_v56 = vpop.permute.xlu2 %497 }
 0x1f3   :  { %v460_v57 = vsel %vm459_vm1, %v458_v47, %v457_v45  ;;  %v954_v45 = vld [vmem:[%s2242_s5 + $0xd0] sm:$0xff] }
 0x1f4   :  { %465 = vst.msk [vmem:[#allocation2 + $0x2] sm:$0x5] %vm1835_vm2, %v460_v57  ;;  %v970_v47 = vld [vmem:[%s2242_s5 + $0x150] sm:$0xff] }
 0x1f5   :  { %475 = vst.msk [vmem:[#allocation2 + $0x4] sm:$0x1] %vm474_vm5, %v472_v48  ;;  %v988_v48 = vld [vmem:[%s2242_s5 + $0x1e0] sm:$0xff] }
 0x1f6   :  { %481 = vst.msk [vmem:[#allocation2 + $0x4] sm:$0x1] %vm480_vm9, %v478_v41  ;;  %v830_v60 = vld [vmem:[#allocation1 + $0x3] ss:$4 sm:$0xff]  ;;  %v782_v61 = vpop.permute.xlu1 %781  ;;  %1116 = vmatpush.msrb.mxu2 %v988_v48 }
 0x1f7   :  { %493 = vst.msk [vmem:[#allocation2 + $0x4] sm:$0x5] %vm1842_vm10, %v488_v59  ;;  %564 = vrot.lane.b32.xlu1 %v1806_v29, %s1350_s19  ;;  %v1292_v62 = vrot.slane %v830_v60, 9  ;;  %v972_v41 = vld [vmem:[%s2242_s5 + $0x160] sm:$0xff]  ;;  %v937_v60 = vld [vmem:[%s2242_s5 + $0x48] sm:$0xff]  ;;  %v1023_v48 = vld [vmem:[%s2242_s5 + $0x2f8] sm:$0xff] }
 0x1f8   :  { %501 = vst.msk [vmem:[#allocation2 + $0x6] sm:$0x1] %vm2247_vm15, %v498_v56  ;;  %vm533_vm15 = vcmask 385088   ;;  %1096 = vmatpush.msra.mxu0 %v972_v41  ;;  %1117 = vmatpush.msrb.mxu2 %v987_v51  ;;  %v1007_v41 = vld [vmem:[%s2242_s5 + $0x278] sm:$0xff]  ;;  %v1005_v51 = vld [vmem:[%s2242_s5 + $0x268] sm:$0xff] }
 0x1f9   :  { %833 = vrot.lane.b32.xlu0 %v1292_v62, %s1357_s26  ;;  %850 = vst.sshfl [vmem:[#allocation1] sm:$0xff pattern:$0x73625140] %v1778_v13  ;;  %v969_v62 = vld [vmem:[%s2242_s5 + $0x148] sm:$0xff] }
 0x1fa   :  { %784 = vst.msk [vmem:[#allocation2 + $0x1] sm:$0x1] %vm410_vm7, %v782_v61  ;;  %v905_v63 = vpop.permute.xlu2 %904  ;;  %1097 = vmatpush.msra.mxu0 %v971_v50  ;;  %1118 = vmatpush.msrb.mxu2 %v986_v55  ;;  %v953_v61 = vld [vmem:[%s2242_s5 + $0xc8] sm:$0xff]  ;;  %v1022_v50 = vld [vmem:[%s2242_s5 + $0x2f0] sm:$0xff] }
 0x1fb   :  { %907 = vst.msk [vmem:[#allocation2 + $0xb] sm:$0x1] %vm410_vm7, %v905_v63  ;;  %vm521_vm7 = vcmask 1041152   ;;  %v985_v63 = vld [vmem:[%s2242_s5 + $0x1c8] sm:$0xff] }
 0x1fc   :  { %1098 = vmatpush.msra.mxu0 %v970_v47  ;;  %1119 = vmatpush.msrb.mxu2 %v985_v63  ;;  %v1004_v47 = vld [vmem:[%s2242_s5 + $0x260] sm:$0xff]  ;;  %v1001_v63 = vld [vmem:[%s2242_s5 + $0x248] sm:$0xff] }
 0x1fe   :  { %v845_v0 = vpop.permute.xlu1 %844  ;;  %1099 = vmatpush.msra.mxu0 %v969_v62  ;;  %v1018_v62 = vld [vmem:[%s2242_s5 + $0x2d0] sm:$0xff] }
 0x1ff   :  { %v846_v1 = vrot.slane %v845_v0, 6 }
 0x200   :  { %v852_v2 = vld [vmem:[#allocation1 + $0x1] ss:$4 sm:$0xff]  ;;  %1100 = vmatpush.msra.mxu0 %v968_v54 }
 0x201   :  { %853 = vrot.lane.b32.xlu0 %v852_v2, %s1358_s27  ;;  %857 = vst.sshfl [vmem:[#allocation1] sm:$0xff pattern:$0x73625140] %v1778_v13  ;;  %v1861_v3 = vsel %vm487_vm6, %v846_v1, %v845_v0  ;;  %vm1869_vm6 = vmor %vm522_vm3, %vm521_vm7  ;;  %v936_v1 = vld [vmem:[%s2242_s5 + $0x40] sm:$0xff] }
 0x202   :  { %v531_v12 = vpop.permute.xlu2 %530  ;;  %v952_v2 = vld [vmem:[%s2242_s5 + $0xc0] sm:$0xff] }
 0x208   :  { %v859_v4 = vld [vmem:[#allocation1 + $0x1] ss:$4 sm:$0xff] }
 0x209   :  { %v1294_v5 = vrot.slane %v859_v4, 9  ;;  %866 = vst.sshfl [vmem:[#allocation1] sm:$0xff pattern:$0x73625140] %v1778_v13  ;;  %538 = vrot.lane.b32.xlu0 %v1800_v27, %s1362_s10  ;;  %v984_v4 = vld [vmem:[%s2242_s5 + $0x1c0] sm:$0xff] }
 0x20a   :  { %v508_v6 = vpop.permute.xlu1 %507  ;;  %1120 = vmatpush.msrb.mxu2 %v984_v4 }
 0x20b   :  { %862 = vrot.lane.b32.xlu2 %v1294_v5, %s1359_s28  ;;  %511 = vst.msk [vmem:[#allocation2 + $0x6] sm:$0x1] %vm510_vm0, %v508_v6  ;;  %v935_v5 = vld [vmem:[%s2242_s5 + $0x38] sm:$0xff] }
 0x20c   :  { %v951_v6 = vld [vmem:[%s2242_s5 + $0xb8] sm:$0xff] }
 0x210   :  { %v868_v7 = vld [vmem:[#allocation1 + $0x2] ss:$4 sm:$0xff]  ;;  %v516_v8 = vpop.permute.xlu0 %515 }
 0x211   :  { %869 = vrot.lane.b32.xlu1 %v868_v7, %s1360_s29  ;;  %875 = vst.sshfl [vmem:[#allocation1] sm:$0xff pattern:$0x73625140] %v1778_v13  ;;  %v517_v10 = vrot.slane %v516_v8, 6  ;;  %v967_v7 = vld [vmem:[%s2242_s5 + $0x138] sm:$0xff] }
 0x212   :  { %1101 = vmatpush.msra.mxu0 %v967_v7  ;;  %v999_v7 = vld [vmem:[%s2242_s5 + $0x238] sm:$0xff] }
 0x213   :  { %v519_v11 = vsel %vm518_vm4, %v517_v10, %v516_v8  ;;  %v983_v8 = vld [vmem:[%s2242_s5 + $0x1b8] sm:$0xff]  ;;  %v934_v10 = vld [vmem:[%s2242_s5 + $0x30] sm:$0xff] }
 0x214   :  { %524 = vst.msk [vmem:[#allocation2 + $0x6] sm:$0x5] %vm1869_vm6, %v519_v11  ;;  %1121 = vmatpush.msrb.mxu2 %v983_v8  ;;  %v1015_v8 = vld [vmem:[%s2242_s5 + $0x2b8] sm:$0xff] }
 0x215   :  { %534 = vst.msk [vmem:[#allocation2 + $0x8] sm:$0x1] %vm533_vm15, %v531_v12  ;;  %v950_v12 = vld [vmem:[%s2242_s5 + $0xb0] sm:$0xff] }
 0x218   :  { %v877_v14 = vld [vmem:[#allocation1 + $0x2] ss:$4 sm:$0xff] }
 0x219   :  { %v1295_v16 = vrot.slane %v877_v14, 9  ;;  %884 = vst.sshfl [vmem:[#allocation1] sm:$0xff pattern:$0x73625140] %v1778_v13  ;;  %v966_v14 = vld [vmem:[%s2242_s5 + $0x130] sm:$0xff] }
 0x21a   :  { %1102 = vmatpush.msra.mxu0 %v966_v14  ;;  %v1013_v14 = vld [vmem:[%s2242_s5 + $0x2a8] sm:$0xff] }
 0x21b   :  { %880 = vrot.lane.b32.xlu1 %v1295_v16, %s1361_s30  ;;  %v982_v16 = vld [vmem:[%s2242_s5 + $0x1b0] sm:$0xff] }
 0x21c   :  { %1122 = vmatpush.msrb.mxu2 %v982_v16  ;;  %v996_v16 = vld [vmem:[%s2242_s5 + $0x220] sm:$0xff] }
 0x220   :  { %v886_v17 = vld [vmem:[#allocation1 + $0x3] ss:$4 sm:$0xff] }
 0x221   :  { %887 = vrot.lane.b32.xlu2 %v886_v17, %s1362_s10  ;;  %891 = vst.sshfl [vmem:[#allocation1] sm:$0xff pattern:$0x73625140] %v1778_v13  ;;  %v1271_v13 = vrot.slane %v1803_v28, 9  ;;  %v959_v28 = vld [vmem:[%s2242_s5 + $0xf8] sm:$0xff] }
 0x222   :  { %1073 = vmatpush.msrb.mxu1 %v959_v28  ;;  %v929_v28 = vld [vmem:[%s2242_s5 + $0x8] sm:$0xff] }
 0x224   :  { %1074 = vmatpush.msrb.mxu1 %v958_v30  ;;  %v977_v30 = vld [vmem:[%s2242_s5 + $0x188] sm:$0xff] }
 0x226   :  { %1075 = vmatpush.msrb.mxu1 %v957_v40  ;;  %v960_v40 = vld [vmem:[%s2242_s5 + $0x100] sm:$0xff] }
 0x228   :  { %v789_v18 = vpop.permute.xlu2 %788  ;;  %v893_v19 = vld [vmem:[#allocation1 + $0x3] ss:$4 sm:$0xff]  ;;  %1076 = vmatpush.msrb.mxu1 %v956_v46 }
 0x229   :  { %791 = vst.msk [vmem:[#allocation2 + $0x1] sm:$0x1] %vm418_vm8, %v789_v18  ;;  %v1296_v20 = vrot.slane %v893_v19, 9  ;;  %v933_v18 = vld [vmem:[%s2242_s5 + $0x28] sm:$0xff] }
 0x22a   :  { %908 = vst.sshfl [vmem:[#allocation1] sm:$0xff pattern:$0x73625140] %v1787_v21  ;;  %1077 = vmatpush.msrb.mxu1 %v955_v43  ;;  %v949_v19 = vld [vmem:[%s2242_s5 + $0xa8] sm:$0xff] }
 0x22b   :  { %896 = vrot.lane.b32.xlu2 %v1296_v20, %s1363_s11 }
 0x22c   :  { %1078 = vmatpush.msrb.mxu1 %v954_v45 }
 0x22e   :  { %1079 = vmatpush.msrb.mxu1 %v953_v61  ;;  %v1002_v61 = vld [vmem:[%s2242_s5 + $0x250] sm:$0xff] }
 0x230   :  { %1080 = vmatpush.msrb.mxu1 %v952_v2  ;;  %v1016_v2 = vld [vmem:[%s2242_s5 + $0x2c0] sm:$0xff] }
 0x231   :  { %v910_v22 = vld [vmem:[#allocation1 + $0x1] ss:$4 sm:$0xff] }
 0x232   :  { %911 = vrot.lane.b32.xlu0 %v910_v22, %s1350_s19  ;;  %915 = vst.sshfl [vmem:[#allocation1] sm:$0xff pattern:$0x73625140] %v1787_v21  ;;  %v943_v21 = vld [vmem:[%s2242_s5 + $0x78] sm:$0xff]  ;;  %1081 = vmatpush.msrb.mxu1 %v951_v6  ;;  %v965_v22 = vld [vmem:[%s2242_s5 + $0x128] sm:$0xff] }
 0x233   :  { %1053 = vmatpush.msrb.mxu3 %v943_v21  ;;  %1103 = vmatpush.msra.mxu0 %v965_v22  ;;  %v978_v21 = vld [vmem:[%s2242_s5 + $0x190] sm:$0xff] }
 0x234   :  { %1082 = vmatpush.msrb.mxu1 %v950_v12  ;;  %v997_v12 = vld [vmem:[%s2242_s5 + $0x228] sm:$0xff]  ;;  %v1026_v22 = vld [vmem:[%s2242_s5 + $0x310] sm:$0xff] }
 0x235   :  { %1054 = vmatpush.msrb.mxu3 %v942_v34  ;;  %v961_v34 = vld [vmem:[%s2242_s5 + $0x108] sm:$0xff] }
 0x236   :  { %1083 = vmatpush.msrb.mxu1 %v949_v19  ;;  %v1011_v19 = vld [vmem:[%s2242_s5 + $0x298] sm:$0xff] }
 0x237   :  { %1055 = vmatpush.msrb.mxu3 %v941_v38  ;;  %v944_v38 = vld [vmem:[%s2242_s5 + $0x80] sm:$0xff] }
 0x239   :  { %v917_v23 = vld [vmem:[#allocation1 + $0x1] ss:$4 sm:$0xff]  ;;  %1056 = vmatpush.msrb.mxu3 %v940_v39 }
 0x23a   :  { %v1298_v15 = vrot.slane %v917_v23, 9  ;;  %v1885_v24 = vpop.permute.xlu0 %573  ;;  %v981_v23 = vld [vmem:[%s2242_s5 + $0x1a8] sm:$0xff] }
 0x23b   :  { %1057 = vmatpush.msrb.mxu3 %v939_v49  ;;  %v575_v0 = vrot.slane %v1885_v24, 6  ;;  %1123 = vmatpush.msrb.mxu2 %v981_v23  ;;  %v1006_v49 = vld [vmem:[%s2242_s5 + $0x270] sm:$0xff] }
 0x23c   :  { %920 = vrot.lane.b32.xlu1 %v1298_v15, %s1353_s22  ;;  %v932_v15 = vld [vmem:[%s2242_s5 + $0x20] sm:$0xff]  ;;  %v994_v23 = vld [vmem:[%s2242_s5 + $0x210] sm:$0xff] }
 0x23d   :  { %1058 = vmatpush.msrb.mxu3 %v938_v53  ;;  %v576_v17 = vsel %vm428_vm11, %v575_v0, %v1885_v24  ;;  %v948_v24 = vld [vmem:[%s2242_s5 + $0xa0] sm:$0xff]  ;;  %1124 = vmatpush.msrb.mxu2 %v980_v58  ;;  %v1021_v53 = vld [vmem:[%s2242_s5 + $0x2e8] sm:$0xff] }
 0x23e   :  { %1084 = vmatpush.msrb.mxu1 %v948_v24  ;;  %v1017_v0 = vld [vmem:[%s2242_s5 + $0x2c8] sm:$0xff] }
 0x23f   :  { %1059 = vmatpush.msrb.mxu3 %v937_v60  ;;  %v1019_v60 = vld [vmem:[%s2242_s5 + $0x2d8] sm:$0xff]  ;;  %v1025_v24 = vld [vmem:[%s2242_s5 + $0x308] sm:$0xff] }
 0x240   :  { %v1009_v58 = vld [vmem:[%s2242_s5 + $0x288] sm:$0xff] }
 0x241   :  { %1060 = vmatpush.msrb.mxu3 %v936_v1  ;;  %v1000_v1 = vld [vmem:[%s2242_s5 + $0x240] sm:$0xff] }
 0x243   :  { %v816_v31 = vpop.permute.xlu2 %815  ;;  %1061 = vmatpush.msrb.mxu3 %v935_v5 }
 0x244   :  { %548 = vrot.lane.b32.xlu1 %v1271_v13, %s1363_s11  ;;  %v947_v13 = vld [vmem:[%s2242_s5 + $0x98] sm:$0xff] }
 0x245   :  { %1062 = vmatpush.msrb.mxu3 %v934_v10  ;;  %1085 = vmatpush.msrb.mxu1 %v947_v13  ;;  %v998_v10 = vld [vmem:[%s2242_s5 + $0x230] sm:$0xff]  ;;  %v1024_v13 = vld [vmem:[%s2242_s5 + $0x300] sm:$0xff] }
 0x247   :  { %1063 = vmatpush.msrb.mxu3 %v933_v18  ;;  %v995_v18 = vld [vmem:[%s2242_s5 + $0x218] sm:$0xff] }
 0x249   :  { %1064 = vmatpush.msrb.mxu3 %v932_v15  ;;  %v1010_v15 = vld [vmem:[%s2242_s5 + $0x290] sm:$0xff] }
 0x24a   :  { %v798_v25 = vpop.permute.xlu0 %797 }
 0x24b   :  { %v799_v26 = vrot.slane %v798_v25, 6 }
 0x24d   :  { %v800_v27 = vsel %vm428_vm11, %v799_v26, %v798_v25  ;;  %v963_v25 = vld [vmem:[%s2242_s5 + $0x118] sm:$0xff] }
 0x24e   :  { %802 = vst.msk [vmem:[#allocation2 + $0x1] sm:$0x5] %vm1817_vm12, %v800_v27  ;;  %v979_v26 = vld [vmem:[%s2242_s5 + $0x198] sm:$0xff]  ;;  %v930_v27 = vld [vmem:[%s2242_s5 + $0x10] sm:$0xff] }
 0x24f   :  { %1125 = vmatpush.msrb.mxu2 %v979_v26  ;;  %v1008_v26 = vld [vmem:[%s2242_s5 + $0x280] sm:$0xff] }
 0x251   :  { %1126 = vmatpush.msrb.mxu2 %v978_v21 }
 0x252   :  { %v807_v29 = vpop.permute.xlu0 %806 }
 0x253   :  { %809 = vst.msk [vmem:[#allocation2 + $0x3] sm:$0x1] %vm441_vm13, %v807_v29  ;;  %v946_v29 = vld [vmem:[%s2242_s5 + $0x90] sm:$0xff]  ;;  %vm2256_vm13 = vcmask 450688   ;;  %1127 = vmatpush.msrb.mxu2 %v977_v30  ;;  %v1195_v30 = vld [vmem:[%s2244_s7 + $0x8] sm:$0xff] }
 0x254   :  { %818 = vst.msk [vmem:[#allocation2 + $0x3] sm:$0x1] %vm451_vm14, %v816_v31  ;;  %v962_v31 = vld [vmem:[%s2242_s5 + $0x110] sm:$0xff]  ;;  %1086 = vmatpush.msrb.mxu1 %v946_v29  ;;  %vm541_vm14 = vcmask 713088  }
 0x255   :  { %1128 = vmatpush.msrb.mxu2 %v976_v37 }
 0x256   :  { %1087 = vmatpush.msrb.mxu1 %v945_v33 }
 0x257   :  { %1218 = vmatpush.msra.mxu2 %v1195_v30 }
 0x258   :  { %1088 = vmatpush.msrb.mxu1 %v944_v38 }
 0x259   :  { %1219 = vmatpush.msra.mxu2 %v1194_v42 }
 0x25a   :  { %1153 = vmatpush.msra.mxu1 %v1023_v48 }
 0x25c   :  { %1154 = vmatpush.msra.mxu1 %v1022_v50 }
 0x25e   :  { %1155 = vmatpush.msra.mxu1 %v1021_v53 }
 0x260   :  { %1156 = vmatpush.msra.mxu1 %v1020_v9 }
 0x261   :  { %v823_v56 = vpop.permute.xlu1 %822 }
 0x262   :  { %v824_v57 = vrot.slane %v823_v56, 6  ;;  %1157 = vmatpush.msra.mxu1 %v1019_v60 }
 0x264   :  { %v825_v59 = vsel %vm459_vm1, %v824_v57, %v823_v56  ;;  %vm551_vm1 = vcmask 1041088   ;;  %1158 = vmatpush.msra.mxu1 %v1018_v62 }
 0x265   :  { %827 = vst.msk [vmem:[#allocation2 + $0x3] sm:$0x5] %vm1835_vm2, %v825_v59  ;;  %v863_v35 = vpop.permute.xlu2 %862  ;;  %v1003_v59 = vld [vmem:[%s2242_s5 + $0x258] sm:$0xff] }
 0x266   :  { %1159 = vmatpush.msra.mxu1 %v1017_v0 }
 0x268   :  { %1160 = vmatpush.msra.mxu1 %v1016_v2 }
 0x269   :  { %v565_v11 = vpop.permute.xlu1 %564 }
 0x26a   :  { %567 = vst.msk [vmem:[#allocation2 + $0xa] sm:$0x1] %vm418_vm8, %v565_v11  ;;  %1161 = vmatpush.msra.mxu1 %v1015_v8  ;;  %v1014_v11 = vld [vmem:[%s2242_s5 + $0x2b0] sm:$0xff] }
 0x26b   :  { %578 = vst.msk [vmem:[#allocation2 + $0xa] sm:$0x5] %vm1817_vm12, %v576_v17  ;;  %v834_v20 = vpop.permute.xlu0 %833  ;;  %v1012_v17 = vld [vmem:[%s2242_s5 + $0x2a0] sm:$0xff] }
 0x26c   :  { %836 = vst.msk [vmem:[#allocation2 + $0x5] sm:$0x1] %vm474_vm5, %v834_v20  ;;  %1162 = vmatpush.msra.mxu1 %v1014_v11  ;;  %v1027_v20 = vld [vmem:[%s2242_s5 + $0x318] sm:$0xff] }
 0x26d   :  { %841 = vst.msk [vmem:[#allocation2 + $0x5] sm:$0x1] %vm480_vm9, %v1830_v52  ;;  %v964_v52 = vld [vmem:[%s2242_s5 + $0x120] sm:$0xff] }
 0x26e   :  { %849 = vst.msk [vmem:[#allocation2 + $0x5] sm:$0x5] %vm1842_vm10, %v1861_v3  ;;  %1104 = vmatpush.msra.mxu0 %v964_v52  ;;  %v931_v3 = vld [vmem:[%s2242_s5 + $0x18] sm:$0xff]  ;;  %1163 = vmatpush.msra.mxu1 %v1013_v14  ;;  %v993_v52 = vld [vmem:[%s2242_s5 + $0x208] sm:$0xff] }
 0x26f   :  { %1065 = vmatpush.msrb.mxu3 %v931_v3 }
 0x270   :  { %1105 = vmatpush.msra.mxu0 %v963_v25  ;;  %1164 = vmatpush.msra.mxu1 %v1012_v17  ;;  %v992_v25 = vld [vmem:[%s2242_s5 + $0x200] sm:$0xff] }
 0x271   :  { %1066 = vmatpush.msrb.mxu3 %v930_v27 }
 0x272   :  { %1106 = vmatpush.msra.mxu0 %v962_v31  ;;  %1165 = vmatpush.msra.mxu1 %v1011_v19 }
 0x273   :  { %v854_v32 = vpop.permute.xlu0 %853  ;;  %1067 = vmatpush.msrb.mxu3 %v929_v28 }
 0x274   :  { %856 = vst.msk [vmem:[#allocation2 + $0x7] sm:$0x1] %vm2256_vm13, %v854_v32  ;;  %1107 = vmatpush.msra.mxu0 %v961_v34  ;;  %1166 = vmatpush.msra.mxu1 %v1010_v15 }
 0x275   :  { %865 = vst.msk [vmem:[#allocation2 + $0x7] sm:$0x1] %vm510_vm0, %v863_v35  ;;  %1068 = vmatpush.msrb.mxu3 %v928_v36  ;;  %v1321_v35 = vld [vmem:[%s2243_s6] ss:$0 sm:$0xff]  ;;  %s1364_s6 = smov [#allocation3]  }
 0x276   :  { %1108 = vmatpush.msra.mxu0 %v960_v40  ;;  %1167 = vmatpush.msra.mxu1 %v1009_v58  ;;  %s1231_s10 = sshll.u32 %s1364_s6, 4  ;;  %s1232_s10 = int_to_ptr.vmem [resolvable:$true] %s1231_s10 }
 0x277   :  { %1133 = vmatpush.msra.mxu3 %v1007_v41 }
 0x278   :  { %1185 = vmatpush.msrb.mxu0 %v1027_v20  ;;  %1168 = vmatpush.msra.mxu1 %v1008_v26 }
 0x279   :  { %1134 = vmatpush.msra.mxu3 %v1006_v49 }
 0x27a   :  { %1186 = vmatpush.msrb.mxu0 %v1026_v22 }
 0x27b   :  { %v539_v44 = vpop.permute.xlu0 %538  ;;  %v888_v45 = vpop.permute.xlu2 %887  ;;  %1135 = vmatpush.msra.mxu3 %v1005_v51 }
 0x27c   :  { %542 = vst.msk [vmem:[#allocation2 + $0x8] sm:$0x1] %vm541_vm14, %v539_v44  ;;  %1187 = vmatpush.msrb.mxu0 %v1025_v24 }
 0x27d   :  { %1136 = vmatpush.msra.mxu3 %v1004_v47  ;;  %v1322_v47 = vld [vmem:[%s2245_s8] ss:$0 sm:$0xff] }
 0x27e   :  { %1188 = vmatpush.msrb.mxu0 %v1024_v13 }
 0x27f   :  { %1137 = vmatpush.msra.mxu3 %v1003_v59 }
 0x281   :  { %1138 = vmatpush.msra.mxu3 %v1002_v61 }
 0x283   :  { %v870_v39 = vpop.permute.xlu1 %869  ;;  %1139 = vmatpush.msra.mxu3 %v1001_v63 }
 0x284   :  { %v871_v46 = vrot.slane %v870_v39, 6 }
 0x285   :  { %v897_v57 = vpop.permute.xlu2 %896  ;;  %1140 = vmatpush.msra.mxu3 %v1000_v1 }
 0x286   :  { %v872_v43 = vsel %vm518_vm4, %v871_v46, %v870_v39 }
 0x287   :  { %874 = vst.msk [vmem:[#allocation2 + $0x7] sm:$0x5] %vm1869_vm6, %v872_v43  ;;  %1141 = vmatpush.msra.mxu3 %v999_v7 }
 0x289   :  { %1142 = vmatpush.msra.mxu3 %v998_v10 }
 0x28b   :  { %1143 = vmatpush.msra.mxu3 %v997_v12 }
 0x28d   :  { %v881_v55 = vpop.permute.xlu1 %880  ;;  %1144 = vmatpush.msra.mxu3 %v996_v16 }
 0x28e   :  { %883 = vst.msk [vmem:[#allocation2 + $0x9] sm:$0x1] %vm533_vm15, %v881_v55  ;;  %v926_v56 = vld [vmem:[#allocation2] sm:$0xff] }
 0x28f   :  { %890 = vst.msk [vmem:[#allocation2 + $0x9] sm:$0x1] %vm541_vm14, %v888_v45  ;;  %1145 = vmatpush.msra.mxu3 %v995_v18 }
 0x290   :  { %1034 = vst [vmem:[#allocation1] ss:$4 sm:$0xff] %v926_v56 }
 0x291   :  { %899 = vst.msk [vmem:[#allocation2 + $0x9] sm:$0x1] %vm551_vm1, %v897_v57  ;;  %1146 = vmatpush.msra.mxu3 %v994_v23 }
 0x293   :  { %1147 = vmatpush.msra.mxu3 %v993_v52 }
 0x295   :  { %1148 = vmatpush.msra.mxu3 %v992_v25 }
 0x297   :  { %v1037_v54 = vld.sshfl [vmem:[#allocation1] sm:$0xff pattern:$0x73625140]  ;;  %v1038_v4 = vld.sshfl [vmem:[#allocation1 + $0x8] sm:$0xff pattern:$0x73625140] }
 0x298   :  { %1069 = vmatmul.f32.vlgmr.msrb.gmra.mxu3 %v1037_v54  ;;  %1089 = vmatmul.f32.vlgmr.msrb.gmra.mxu1 %v1038_v4  ;;  %v1039_v5 = vld.sshfl [vmem:[#allocation1 + $0x10] sm:$0xff pattern:$0x73625140]  ;;  %v1040_v6 = vld.sshfl [vmem:[#allocation1 + $0x18] sm:$0xff pattern:$0x73625140] }
 0x299   :  { %1109 = vmatmul.f32.vlgmr.msra.gmra.mxu0 %v1039_v5  ;;  %1129 = vmatmul.f32.vlgmr.msrb.gmra.mxu2 %v1040_v6 }
 0x2a4   :  { %v912_v3 = vpop.permute.xlu0 %911 }
 0x2a5   :  { %914 = vst.msk [vmem:[#allocation2 + $0xb] sm:$0x1] %vm418_vm8, %v912_v3  ;;  %vm1050_vm8 = vcmask 261120  }
 0x2ae   :  { %v921_v27 = vpop.permute.xlu1 %920 }
 0x2af   :  { %v922_v29 = vrot.slane %v921_v27, 6 }
 0x2b1   :  { %v923_v31 = vsel %vm428_vm11, %v922_v29, %v921_v27  ;;  %vm1200_vm11 = vcmask 130048  }
 0x2b2   :  { %925 = vst.msk [vmem:[#allocation2 + $0xb] sm:$0x5] %vm1817_vm12, %v923_v31  ;;  %vm1224_vm12 = vcmask 74752  }
 0x2b6   :  { %v549_v21 = vpop.permute.xlu1 %548 }
 0x2b7   :  { %552 = vst.msk [vmem:[#allocation2 + $0x8] sm:$0x1] %vm551_vm1, %v549_v21 }
 0x2be   :  { %v927_v28 = vld [vmem:[#allocation2 + $0x8] sm:$0x3f] }
 0x2bf   :  { %1036 = vst [vmem:[#allocation1 + $0x20] ss:$4 sm:$0xff] %v927_v28 }
 0x2c6   :  { %v1041_v32 = vld.sshfl [vmem:[#allocation1 + $0x20] sm:$0xff pattern:$0x73625140]  ;;  %v1042_v33 = vld.sshfl [vmem:[#allocation1 + $0x28] sm:$0xff pattern:$0x73625140] }
 0x2c7   :  { %1149 = vmatmul.f32.vlgmr.msra.gmra.mxu3 %v1041_v32  ;;  %1169 = vmatmul.f32.vlgmr.msra.gmra.mxu1 %v1042_v33  ;;  %v1043_v34 = vld.sshfl [vmem:[#allocation1 + $0x30] sm:$0xff pattern:$0x73625140] }
 0x2c8   :  { %1299 = vmatmul.msk.f32.vlgmr.msrb.gmra.mxu0 %vm1050_vm8, %v1043_v34 }
 0x315   :  { %v1090_v40 = vpop.f32.mrf.mxu1 }
 0x316   :  { %v1110_v44 = vpop.f32.mrf.mxu0 }
 0x31b   :  { %v1070_v36 = vpop.f32.mrf.mxu3 }
 0x31c   :  { %v1071_v38 = vadd.f32 %v1321_v35, %v1070_v36  ;;  %v1130_v46 = vpop.f32.mrf.mxu2 }
 0x31e   :  { %v1091_v37 = vadd.f32 %v1090_v40, %v1071_v38 }
 0x320   :  { %v1111_v39 = vadd.f32 %v1110_v44, %v1091_v37 }
 0x322   :  { %v1131_v41 = vadd.f32 %v1130_v46, %v1111_v39 }
 0x344   :  { %v1170_v43 = vpop.f32.mrf.mxu1 }
 0x345   :  { %v1190_v51 = vpop.f32.mrf.mxu0 }
 0x34a   :  { %v1150_v48 = vpop.f32.mrf.mxu3 }
 0x34b   :  { %v1151_v49 = vadd.f32 %v1150_v48, %v1131_v41 }
 0x34d   :  { %v1171_v50 = vadd.f32 %v1170_v43, %v1151_v49 }
 0x34f   :  { %v1191_v53 = vadd.f32 %v1190_v51, %v1171_v50 }
 0x351   :  { %v1193_v45 = vmax.f32 %v1191_v53, 0.0 }
 0x353   :  { %1300 = vmatmul.msk.f32.vlgmr.msra.gmra.mxu2 %vm1200_vm11, %v1193_v45 }
 0x3d6   :  { %v1221_v9 = vpop.f32.mrf.mxu2 }
 0x3d7   :  { %v1222_v55 = vadd.f32 %v1322_v47, %v1221_v9 }
 0x3d9   :  { %1225 = vst.msk [vmem:[#allocation3] sm:$0x3] %vm1224_vm12, %v1222_v55 }
 0x3da   :  { %1236 = dma.vmem_to_hbm [thread:$0]  %s1232_s10, 32, %s1234_s13, [#allocation4]  }
 0x3db   :  { %1347 = dma.done.wait [#allocation4], 32  }
 0x3dc   :  { %1348 = vsyncadd [#allocation4], 4294967264 }
 0x3dd   :  { %1241 = vsyncpa [#allocation4], 1 }

</bundles_post_ra>
